<compile_context>
chip_gen: v7x
topology: tpu7x:2x2x1
jax: 0.10.0
libtpu: 0.0.40
codegen_flags: <defaults>
</compile_context>

<pallas_src>
import jax
import jax.numpy as jnp
from jax.experimental import pallas as pl
from jax.experimental.pallas import tpu as pltpu

KSIZE = 3      # both Conv1d layers use kernel_size=3
POOL1 = 12     # MaxPool1d(12, stride=12)
POOL2 = 3      # MaxPool1d(3, stride=3)


# ------------------------------- kernel -------------------------------------


def _cnn_fused_kernel(x_ref, w1_ref, s1_ref, w2_ref, s2_ref,
                      fc1w_ref, fc1b_ref, fc2w_ref, fc2b_ref,
                      o_ref,
                      xim_ref, h1_ref, pad_ref, him_ref, h2_ref, feat_ref):
    cin = x_ref.shape[2]                 # 64
    cmid = w1_ref.shape[1]               # 128
    lc1 = x_ref.shape[1] - (KSIZE - 1)   # conv1 valid output length (360)
    lo1 = lc1 // POOL1                   # after MaxPool1d(12)  (30)
    lo2 = lo1 // POOL2                   # after MaxPool1d(3)   (10)

    # ---- Conv1d(64->128, k=3, valid) + folded BN + ReLU: one K=3*cin matmul --
    for k in range(KSIZE):
        xim_ref[:, k * cin:(k + 1) * cin] = x_ref[0, pl.ds(k, lc1), :]
    h = jnp.dot(xim_ref[...].astype(jnp.bfloat16), w1_ref[...],
                preferred_element_type=jnp.float32)
    h1_ref[...] = jnp.maximum(h + s1_ref[...], 0.0)

    # ---- MaxPool1d(12) via sublane-strided loads; zero-pad edges for conv2 ---
    p = h1_ref[pl.ds(0, lo1, stride=POOL1), :]
    for k in range(1, POOL1):
        p = jnp.maximum(p, h1_ref[pl.ds(k, lo1, stride=POOL1), :])
    pad_ref[...] = jnp.zeros_like(pad_ref)   # rows 0 and lo1+1 stay zero (pad=1)
    pad_ref[pl.ds(1, lo1), :] = p

    # ---- Conv1d(128->128, k=3, pad=1) + folded BN + ReLU: K=3*128 matmul -----
    for k in range(KSIZE):
        him_ref[:, k * cmid:(k + 1) * cmid] = pad_ref[pl.ds(k, lo1), :]
    h = jnp.dot(him_ref[...].astype(jnp.bfloat16), w2_ref[...],
                preferred_element_type=jnp.float32)
    h2_ref[...] = jnp.maximum(h + s2_ref[...], 0.0)

    # ---- MaxPool1d(3) fused with the position-major flatten ------------------
    # (fc1's weight rows were pre-permuted to absorb torch's channel-major
    #  flatten of the (N, C, L) tensor, so no runtime transpose is needed.)
    for l in range(lo2):
        feat_ref[:, pl.ds(l * cmid, cmid)] = jnp.max(
            h2_ref[pl.ds(l * POOL2, POOL2), :], axis=0, keepdims=True)

    # ---- Linear(1280,128)+ReLU -> Linear(128,2) -> softmax -------------------
    g = jnp.dot(feat_ref[...].astype(jnp.bfloat16), fc1w_ref[...],
                preferred_element_type=jnp.float32)
    g = jnp.maximum(g + fc1b_ref[...], 0.0)
    logits = jnp.dot(g.astype(jnp.bfloat16), fc2w_ref[...],
                     preferred_element_type=jnp.float32) + fc2b_ref[...]
    m = jnp.max(logits, axis=-1, keepdims=True)
    e = jnp.exp(logits - m)
    o_ref[0] = e / jnp.sum(e, axis=-1, keepdims=True)


# ------------------------------- wrapper ------------------------------------


def cnn_forward_fused(x, params):
    if x.ndim == 2:                      # torch: unsqueeze single samples
        x = x[None]
    x = x.astype(jnp.float32)            # torch does x.float()
    B, L, cin = x.shape
    lc1 = L - (KSIZE - 1)
    lo1 = lc1 // POOL1
    lo2 = lo1 // POOL2
    cmid = params["w1"].shape[1]
    nfeat = lo2 * cmid
    nout = params["fc2_w"].shape[1]
    assert params["fc1_w"].shape[0] == nfeat, "maxlen must flatten to fc1's input"

    def const_spec(shape):
        zeros = (0,) * len(shape)
        return pl.BlockSpec(shape, lambda b: zeros)

    out = pl.pallas_call(
        _cnn_fused_kernel,
        out_shape=jax.ShapeDtypeStruct((B, 1, nout), jnp.float32),
        grid=(B,),
        in_specs=[
            pl.BlockSpec((1, L, cin), lambda b: (b, 0, 0)),       # x (per sample)
            const_spec((KSIZE * cin, cmid)), const_spec((1, cmid)),   # conv1
            const_spec((KSIZE * cmid, cmid)), const_spec((1, cmid)),  # conv2
            const_spec((nfeat, cmid)), const_spec((1, cmid)),         # fc1
            const_spec((cmid, nout)), const_spec((1, nout)),          # fc2
        ],
        out_specs=pl.BlockSpec((1, 1, nout), lambda b: (b, 0, 0)),
        scratch_shapes=[
            pltpu.VMEM((lc1, KSIZE * cin), jnp.float32),   # im2col for conv1
            pltpu.VMEM((lc1, cmid), jnp.float32),          # conv1 output
            pltpu.VMEM((lo1 + 2, cmid), jnp.float32),      # pooled + pad=1 edges
            pltpu.VMEM((lo1, KSIZE * cmid), jnp.float32),  # im2col for conv2
            pltpu.VMEM((lo1, cmid), jnp.float32),          # conv2 output
            pltpu.VMEM((1, nfeat), jnp.float32),           # flattened features
        ],
        compiler_params=pltpu.CompilerParams(
            dimension_semantics=("parallel",)),
    )(x, params["w1"], params["s1"], params["w2"], params["s2"],
      params["fc1_w"], params["fc1_b"], params["fc2_w"], params["fc2_b"])
    return out.reshape(B, nout)


cnn_forward = jax.jit(cnn_forward_fused)


# ------------------------- params (torch layout + prep) ----------------------


def init_torch_params(key):
    """Random parameters in the PyTorch module's native layouts."""
    ks = jax.random.split(key, 8)
    return {
        "conv1_w": jax.random.normal(ks[0], (128, 64, 3), jnp.float32) * 0.05,
        "conv1_b": jax.random.normal(ks[1], (128,), jnp.float32) * 0.05,
        "conv2_w": jax.random.normal(ks[2], (128, 128, 3), jnp.float32) * 0.05,
        "conv2_b": jax.random.normal(ks[3], (128,), jnp.float32) * 0.05,
        # BatchNorm1d(128) defaults (eval mode): gamma=1, beta=0, mean=0, var=1
        "bn1_gamma": jnp.ones((128,), jnp.float32),
        "bn1_beta": jnp.zeros((128,), jnp.float32),
        "bn1_mean": jnp.zeros((128,), jnp.float32),
        "bn1_var": jnp.ones((128,), jnp.float32),
        "bn2_gamma": jnp.ones((128,), jnp.float32),
        "bn2_beta": jnp.zeros((128,), jnp.float32),
        "bn2_mean": jnp.zeros((128,), jnp.float32),
        "bn2_var": jnp.ones((128,), jnp.float32),
        # Linear weights stored (in, out); fc1's input index = c*10 + l,
        # i.e. torch's flatten order of the (N, C=128, L=10) tensor.
        "fc1_w": jax.random.normal(ks[4], (1280, 128), jnp.float32) * 0.02,
        "fc1_b": jax.random.normal(ks[5], (128,), jnp.float32) * 0.02,
        "fc2_w": jax.random.normal(ks[6], (128, 2), jnp.float32) * 0.02,
        "fc2_b": jax.random.normal(ks[7], (2,), jnp.float32) * 0.02,
    }


def prepare_params(p, eps=1e-5, pooled_len=10):
    """Fold eval-mode BN into im2col conv weights; permute fc1 rows; cast bf16."""
    def fold(w, b, gamma, beta, mean, var):
        scale = gamma / jnp.sqrt(var + eps)               # (cout,)
        shift = beta - mean * scale                       # (cout,)
        taps = [w[:, :, k].T for k in range(w.shape[2])]  # each (cin, cout)
        w_im = jnp.concatenate(taps, axis=0) * scale[None, :]   # (k*cin, cout)
        s = (b * scale + shift)[None, :]
        return w_im.astype(jnp.bfloat16), s.astype(jnp.float32)

    w1, s1 = fold(p["conv1_w"], p["conv1_b"], p["bn1_gamma"], p["bn1_beta"],
                  p["bn1_mean"], p["bn1_var"])
    w2, s2 = fold(p["conv2_w"], p["conv2_b"], p["bn2_gamma"], p["bn2_beta"],
                  p["bn2_mean"], p["bn2_var"])
    # Kernel flattens position-major (l*C + c); torch flattens channel-major
    # (c*pooled_len + l). Permute fc1's rows once so the kernel needs no
    # runtime transpose of the activations.
    nfeat = p["fc1_w"].shape[0]
    C = nfeat // pooled_len
    r = jnp.arange(nfeat)
    perm = (r % C) * pooled_len + (r // C)
    return {
        "w1": w1, "s1": s1, "w2": w2, "s2": s2,
        "fc1_w": p["fc1_w"][perm].astype(jnp.bfloat16),
        "fc1_b": p["fc1_b"][None, :].astype(jnp.float32),
        "fc2_w": p["fc2_w"].astype(jnp.bfloat16),
        "fc2_b": p["fc2_b"][None, :].astype(jnp.float32),
    }


# --------------------------------- main --------------------------------------


if __name__ == "__main__":
    # maxlen=362: conv(k=3) -> 360, pool12 -> 30, conv(k=3, pad=1) -> 30,
    # pool3 -> 10; 128 channels * 10 = 1280 = Linear(1280, 128) input size.
    B, maxlen, Cin = 2, 362, 64
    key = jax.random.PRNGKey(0)
    kx, kp = jax.random.split(key)
    x = jax.random.normal(kx, (B, maxlen, Cin), jnp.float32)
    params = prepare_params(init_torch_params(kp))

    probs = cnn_forward(x, params)
    probs = jax.block_until_ready(probs)

    assert probs.shape == (B, 2), probs.shape
    assert bool(jnp.all(jnp.isfinite(probs)))
    assert bool(jnp.allclose(jnp.sum(probs, axis=1), 1.0, atol=1e-5))
    print("KERNEL_OK")
</pallas_src>

<mosaic_0001>
module attributes {stable_mosaic.version = 11 : i64} {
  func.func @_cnn_fused_kernel(%arg0: i32, %arg1: memref<1x362x64xf32, #tpu.memory_space<vmem>>, %arg2: memref<192x128xbf16, #tpu.memory_space<vmem>>, %arg3: memref<1x128xf32, #tpu.memory_space<vmem>>, %arg4: memref<384x128xbf16, #tpu.memory_space<vmem>>, %arg5: memref<1x128xf32, #tpu.memory_space<vmem>>, %arg6: memref<1280x128xbf16, #tpu.memory_space<vmem>>, %arg7: memref<1x128xf32, #tpu.memory_space<vmem>>, %arg8: memref<128x2xbf16, #tpu.memory_space<vmem>>, %arg9: memref<1x2xf32, #tpu.memory_space<vmem>>, %arg10: memref<1x1x2xf32, #tpu.memory_space<vmem>>, %arg11: memref<360x192xf32, #tpu.memory_space<vmem>>, %arg12: memref<360x128xf32, #tpu.memory_space<vmem>>, %arg13: memref<32x128xf32, #tpu.memory_space<vmem>>, %arg14: memref<30x384xf32, #tpu.memory_space<vmem>>, %arg15: memref<30x128xf32, #tpu.memory_space<vmem>>, %arg16: memref<1x1280xf32, #tpu.memory_space<vmem>>) attributes {dimension_semantics = [#tpu.dimension_semantics<parallel>], iteration_bounds = array<i64: 2>, scalar_prefetch = 0 : i64, scratch_operands = 6 : i64, tpu.core_type = #tpu.core_type<tc>, window_params = [{transform_indices = @transform_0, window_bounds = array<i64: 1, 362, 64>}, {pipeline_mode = #tpu.pipeline_mode<synchronous>, transform_indices = @transform_1, window_bounds = array<i64: 192, 128>}, {pipeline_mode = #tpu.pipeline_mode<synchronous>, transform_indices = @transform_2, window_bounds = array<i64: 1, 128>}, {pipeline_mode = #tpu.pipeline_mode<synchronous>, transform_indices = @transform_3, window_bounds = array<i64: 384, 128>}, {pipeline_mode = #tpu.pipeline_mode<synchronous>, transform_indices = @transform_4, window_bounds = array<i64: 1, 128>}, {pipeline_mode = #tpu.pipeline_mode<synchronous>, transform_indices = @transform_5, window_bounds = array<i64: 1280, 128>}, {pipeline_mode = #tpu.pipeline_mode<synchronous>, transform_indices = @transform_6, window_bounds = array<i64: 1, 128>}, {pipeline_mode = #tpu.pipeline_mode<synchronous>, transform_indices = @transform_7, window_bounds = array<i64: 128, 2>}, {pipeline_mode = #tpu.pipeline_mode<synchronous>, transform_indices = @transform_8, window_bounds = array<i64: 1, 2>}, {transform_indices = @transform_9, window_bounds = array<i64: 1, 1, 2>}]} {
    %c0 = arith.constant 0 : index
    %c0_0 = arith.constant 0 : index
    %c0_1 = arith.constant 0 : index
    %0 = vector.load %arg1[%c0, %c0_0, %c0_1] : memref<1x362x64xf32, #tpu.memory_space<vmem>>, vector<1x360x64xf32>
    %1 = vector.shape_cast %0 : vector<1x360x64xf32> to vector<360x64xf32>
    %c0_2 = arith.constant 0 : index
    %c0_3 = arith.constant 0 : index
    %2 = vector.load %arg11[%c0_2, %c0_3] : memref<360x192xf32, #tpu.memory_space<vmem>>, vector<360x64xf32>
    tpu.vector_store %arg11[%c0_2, %c0_3], %1 {strides = array<i32>} : memref<360x192xf32, #tpu.memory_space<vmem>>, vector<360x64xf32>,
    %c0_4 = arith.constant 0 : index
    %c1 = arith.constant 1 : index
    %c0_5 = arith.constant 0 : index
    %3 = vector.load %arg1[%c0_4, %c1, %c0_5] : memref<1x362x64xf32, #tpu.memory_space<vmem>>, vector<1x360x64xf32>
    %4 = vector.shape_cast %3 : vector<1x360x64xf32> to vector<360x64xf32>
    %c0_6 = arith.constant 0 : index
    %c64 = arith.constant 64 : index
    %5 = vector.load %arg11[%c0_6, %c64] : memref<360x192xf32, #tpu.memory_space<vmem>>, vector<360x64xf32>
    tpu.vector_store %arg11[%c0_6, %c64], %4 {strides = array<i32>} : memref<360x192xf32, #tpu.memory_space<vmem>>, vector<360x64xf32>,
    %c0_7 = arith.constant 0 : index
    %c2 = arith.constant 2 : index
    %c0_8 = arith.constant 0 : index
    %6 = vector.load %arg1[%c0_7, %c2, %c0_8] : memref<1x362x64xf32, #tpu.memory_space<vmem>>, vector<1x360x64xf32>
    %7 = vector.shape_cast %6 : vector<1x360x64xf32> to vector<360x64xf32>
    %c0_9 = arith.constant 0 : index
    %c128 = arith.constant 128 : index
    %8 = vector.load %arg11[%c0_9, %c128] : memref<360x192xf32, #tpu.memory_space<vmem>>, vector<360x64xf32>
    tpu.vector_store %arg11[%c0_9, %c128], %7 {strides = array<i32>} : memref<360x192xf32, #tpu.memory_space<vmem>>, vector<360x64xf32>,
    %c0_10 = arith.constant 0 : index
    %c0_11 = arith.constant 0 : index
    %9 = vector.load %arg11[%c0_10, %c0_11] : memref<360x192xf32, #tpu.memory_space<vmem>>, vector<360x192xf32>
    %10 = arith.truncf %9 : vector<360x192xf32> to vector<360x192xbf16>
    %c0_12 = arith.constant 0 : index
    %c0_13 = arith.constant 0 : index
    %11 = vector.load %arg2[%c0_12, %c0_13] : memref<192x128xbf16, #tpu.memory_space<vmem>>, vector<192x128xbf16>
    %cst = arith.constant dense<0.000000e+00> : vector<360x128xf32>
    %12 = tpu.matmul %10, %11, %cst {dimension_numbers = #tpu.dot_dimension_numbers<[1], [0], [0], [1], [0, 0, 1, 1], [], []>} : vector<360x192xbf16>, vector<192x128xbf16>, vector<360x128xf32> -> vector<360x128xf32>
    %c0_14 = arith.constant 0 : index
    %c0_15 = arith.constant 0 : index
    %13 = vector.load %arg3[%c0_14, %c0_15] : memref<1x128xf32, #tpu.memory_space<vmem>>, vector<1x128xf32>
    %14 = vector.broadcast %13 : vector<1x128xf32> to vector<360x128xf32>
    %15 = arith.addf %12, %14 : vector<360x128xf32>
    %cst_16 = arith.constant 0.000000e+00 : f32
    %16 = vector.broadcast %cst_16 : f32 to vector<360x128xf32>
    %17 = arith.maximumf %15, %16 : vector<360x128xf32>
    %c0_17 = arith.constant 0 : index
    %c0_18 = arith.constant 0 : index
    %18 = vector.load %arg12[%c0_17, %c0_18] : memref<360x128xf32, #tpu.memory_space<vmem>>, vector<360x128xf32>
    tpu.vector_store %arg12[%c0_17, %c0_18], %17 {strides = array<i32>} : memref<360x128xf32, #tpu.memory_space<vmem>>, vector<360x128xf32>,
    %c0_19 = arith.constant 0 : index
    %c0_20 = arith.constant 0 : index
    %19 = tpu.strided_load %arg12[%c0_19, %c0_20] {strides = array<i32: 12, 1>} : memref<360x128xf32, #tpu.memory_space<vmem>>, vector<30x128xf32>
    %c1_21 = arith.constant 1 : index
    %c0_22 = arith.constant 0 : index
    %20 = tpu.strided_load %arg12[%c1_21, %c0_22] {strides = array<i32: 12, 1>} : memref<360x128xf32, #tpu.memory_space<vmem>>, vector<30x128xf32>
    %21 = arith.maximumf %19, %20 : vector<30x128xf32>
    %c2_23 = arith.constant 2 : index
    %c0_24 = arith.constant 0 : index
    %22 = tpu.strided_load %arg12[%c2_23, %c0_24] {strides = array<i32: 12, 1>} : memref<360x128xf32, #tpu.memory_space<vmem>>, vector<30x128xf32>
    %23 = arith.maximumf %21, %22 : vector<30x128xf32>
    %c3 = arith.constant 3 : index
    %c0_25 = arith.constant 0 : index
    %24 = tpu.strided_load %arg12[%c3, %c0_25] {strides = array<i32: 12, 1>} : memref<360x128xf32, #tpu.memory_space<vmem>>, vector<30x128xf32>
    %25 = arith.maximumf %23, %24 : vector<30x128xf32>
    %c4 = arith.constant 4 : index
    %c0_26 = arith.constant 0 : index
    %26 = tpu.strided_load %arg12[%c4, %c0_26] {strides = array<i32: 12, 1>} : memref<360x128xf32, #tpu.memory_space<vmem>>, vector<30x128xf32>
    %27 = arith.maximumf %25, %26 : vector<30x128xf32>
    %c5 = arith.constant 5 : index
    %c0_27 = arith.constant 0 : index
    %28 = tpu.strided_load %arg12[%c5, %c0_27] {strides = array<i32: 12, 1>} : memref<360x128xf32, #tpu.memory_space<vmem>>, vector<30x128xf32>
    %29 = arith.maximumf %27, %28 : vector<30x128xf32>
    %c6 = arith.constant 6 : index
    %c0_28 = arith.constant 0 : index
    %30 = tpu.strided_load %arg12[%c6, %c0_28] {strides = array<i32: 12, 1>} : memref<360x128xf32, #tpu.memory_space<vmem>>, vector<30x128xf32>
    %31 = arith.maximumf %29, %30 : vector<30x128xf32>
    %c7 = arith.constant 7 : index
    %c0_29 = arith.constant 0 : index
    %32 = tpu.strided_load %arg12[%c7, %c0_29] {strides = array<i32: 12, 1>} : memref<360x128xf32, #tpu.memory_space<vmem>>, vector<30x128xf32>
    %33 = arith.maximumf %31, %32 : vector<30x128xf32>
    %c8 = arith.constant 8 : index
    %c0_30 = arith.constant 0 : index
    %34 = tpu.strided_load %arg12[%c8, %c0_30] {strides = array<i32: 12, 1>} : memref<360x128xf32, #tpu.memory_space<vmem>>, vector<30x128xf32>
    %35 = arith.maximumf %33, %34 : vector<30x128xf32>
    %c9 = arith.constant 9 : index
    %c0_31 = arith.constant 0 : index
    %36 = tpu.strided_load %arg12[%c9, %c0_31] {strides = array<i32: 12, 1>} : memref<360x128xf32, #tpu.memory_space<vmem>>, vector<30x128xf32>
    %37 = arith.maximumf %35, %36 : vector<30x128xf32>
    %c10 = arith.constant 10 : index
    %c0_32 = arith.constant 0 : index
    %38 = tpu.strided_load %arg12[%c10, %c0_32] {strides = array<i32: 12, 1>} : memref<360x128xf32, #tpu.memory_space<vmem>>, vector<30x128xf32>
    %39 = arith.maximumf %37, %38 : vector<30x128xf32>
    %c11 = arith.constant 11 : index
    %c0_33 = arith.constant 0 : index
    %40 = tpu.strided_load %arg12[%c11, %c0_33] {strides = array<i32: 12, 1>} : memref<360x128xf32, #tpu.memory_space<vmem>>, vector<30x128xf32>
    %41 = arith.maximumf %39, %40 : vector<30x128xf32>
    %cst_34 = arith.constant 0.000000e+00 : f32
    %42 = vector.broadcast %cst_34 : f32 to vector<32x128xf32>
    %c0_35 = arith.constant 0 : index
    %c0_36 = arith.constant 0 : index
    %43 = vector.load %arg13[%c0_35, %c0_36] : memref<32x128xf32, #tpu.memory_space<vmem>>, vector<32x128xf32>
    tpu.vector_store %arg13[%c0_35, %c0_36], %42 {strides = array<i32>} : memref<32x128xf32, #tpu.memory_space<vmem>>, vector<32x128xf32>,
    %c1_37 = arith.constant 1 : index
    %c0_38 = arith.constant 0 : index
    %44 = vector.load %arg13[%c1_37, %c0_38] : memref<32x128xf32, #tpu.memory_space<vmem>>, vector<30x128xf32>
    tpu.vector_store %arg13[%c1_37, %c0_38], %41 {strides = array<i32>} : memref<32x128xf32, #tpu.memory_space<vmem>>, vector<30x128xf32>,
    %c0_39 = arith.constant 0 : index
    %c0_40 = arith.constant 0 : index
    %45 = vector.load %arg13[%c0_39, %c0_40] : memref<32x128xf32, #tpu.memory_space<vmem>>, vector<30x128xf32>
    %c0_41 = arith.constant 0 : index
    %c0_42 = arith.constant 0 : index
    %46 = vector.load %arg14[%c0_41, %c0_42] : memref<30x384xf32, #tpu.memory_space<vmem>>, vector<30x128xf32>
    tpu.vector_store %arg14[%c0_41, %c0_42], %45 {strides = array<i32>} : memref<30x384xf32, #tpu.memory_space<vmem>>, vector<30x128xf32>,
    %c1_43 = arith.constant 1 : index
    %c0_44 = arith.constant 0 : index
    %47 = vector.load %arg13[%c1_43, %c0_44] : memref<32x128xf32, #tpu.memory_space<vmem>>, vector<30x128xf32>
    %c0_45 = arith.constant 0 : index
    %c128_46 = arith.constant 128 : index
    %48 = vector.load %arg14[%c0_45, %c128_46] : memref<30x384xf32, #tpu.memory_space<vmem>>, vector<30x128xf32>
    tpu.vector_store %arg14[%c0_45, %c128_46], %47 {strides = array<i32>} : memref<30x384xf32, #tpu.memory_space<vmem>>, vector<30x128xf32>,
    %c2_47 = arith.constant 2 : index
    %c0_48 = arith.constant 0 : index
    %49 = vector.load %arg13[%c2_47, %c0_48] : memref<32x128xf32, #tpu.memory_space<vmem>>, vector<30x128xf32>
    %c0_49 = arith.constant 0 : index
    %c256 = arith.constant 256 : index
    %50 = vector.load %arg14[%c0_49, %c256] : memref<30x384xf32, #tpu.memory_space<vmem>>, vector<30x128xf32>
    tpu.vector_store %arg14[%c0_49, %c256], %49 {strides = array<i32>} : memref<30x384xf32, #tpu.memory_space<vmem>>, vector<30x128xf32>,
    %c0_50 = arith.constant 0 : index
    %c0_51 = arith.constant 0 : index
    %51 = vector.load %arg14[%c0_50, %c0_51] : memref<30x384xf32, #tpu.memory_space<vmem>>, vector<30x384xf32>
    %52 = arith.truncf %51 : vector<30x384xf32> to vector<30x384xbf16>
    %c0_52 = arith.constant 0 : index
    %c0_53 = arith.constant 0 : index
    %53 = vector.load %arg4[%c0_52, %c0_53] : memref<384x128xbf16, #tpu.memory_space<vmem>>, vector<384x128xbf16>
    %cst_54 = arith.constant dense<0.000000e+00> : vector<30x128xf32>
    %54 = tpu.matmul %52, %53, %cst_54 {dimension_numbers = #tpu.dot_dimension_numbers<[1], [0], [0], [1], [0, 0, 1, 1], [], []>} : vector<30x384xbf16>, vector<384x128xbf16>, vector<30x128xf32> -> vector<30x128xf32>
    %c0_55 = arith.constant 0 : index
    %c0_56 = arith.constant 0 : index
    %55 = vector.load %arg5[%c0_55, %c0_56] : memref<1x128xf32, #tpu.memory_space<vmem>>, vector<1x128xf32>
    %56 = vector.broadcast %55 : vector<1x128xf32> to vector<30x128xf32>
    %57 = arith.addf %54, %56 : vector<30x128xf32>
    %cst_57 = arith.constant 0.000000e+00 : f32
    %58 = vector.broadcast %cst_57 : f32 to vector<30x128xf32>
    %59 = arith.maximumf %57, %58 : vector<30x128xf32>
    %c0_58 = arith.constant 0 : index
    %c0_59 = arith.constant 0 : index
    %60 = vector.load %arg15[%c0_58, %c0_59] : memref<30x128xf32, #tpu.memory_space<vmem>>, vector<30x128xf32>
    tpu.vector_store %arg15[%c0_58, %c0_59], %59 {strides = array<i32>} : memref<30x128xf32, #tpu.memory_space<vmem>>, vector<30x128xf32>,
    %c0_60 = arith.constant 0 : index
    %c0_61 = arith.constant 0 : index
    %61 = vector.load %arg15[%c0_60, %c0_61] : memref<30x128xf32, #tpu.memory_space<vmem>>, vector<3x128xf32>
    %cst_62 = arith.constant dense<0xFF800000> : vector<128xf32>
    %62 = vector.multi_reduction <maximumf>, %61, %cst_62 [0] : vector<3x128xf32> to vector<128xf32>
    %63 = vector.shape_cast %62 : vector<128xf32> to vector<1x128xf32>
    %c0_63 = arith.constant 0 : index
    %c0_64 = arith.constant 0 : index
    %64 = vector.load %arg16[%c0_63, %c0_64] : memref<1x1280xf32, #tpu.memory_space<vmem>>, vector<1x128xf32>
    tpu.vector_store %arg16[%c0_63, %c0_64], %63 {strides = array<i32>} : memref<1x1280xf32, #tpu.memory_space<vmem>>, vector<1x128xf32>,
    %c3_65 = arith.constant 3 : index
    %c0_66 = arith.constant 0 : index
    %65 = vector.load %arg15[%c3_65, %c0_66] : memref<30x128xf32, #tpu.memory_space<vmem>>, vector<3x128xf32>
    %cst_67 = arith.constant dense<0xFF800000> : vector<128xf32>
    %66 = vector.multi_reduction <maximumf>, %65, %cst_67 [0] : vector<3x128xf32> to vector<128xf32>
    %67 = vector.shape_cast %66 : vector<128xf32> to vector<1x128xf32>
    %c0_68 = arith.constant 0 : index
    %c128_69 = arith.constant 128 : index
    %68 = vector.load %arg16[%c0_68, %c128_69] : memref<1x1280xf32, #tpu.memory_space<vmem>>, vector<1x128xf32>
    tpu.vector_store %arg16[%c0_68, %c128_69], %67 {strides = array<i32>} : memref<1x1280xf32, #tpu.memory_space<vmem>>, vector<1x128xf32>,
    %c6_70 = arith.constant 6 : index
    %c0_71 = arith.constant 0 : index
    %69 = vector.load %arg15[%c6_70, %c0_71] : memref<30x128xf32, #tpu.memory_space<vmem>>, vector<3x128xf32>
    %cst_72 = arith.constant dense<0xFF800000> : vector<128xf32>
    %70 = vector.multi_reduction <maximumf>, %69, %cst_72 [0] : vector<3x128xf32> to vector<128xf32>
    %71 = vector.shape_cast %70 : vector<128xf32> to vector<1x128xf32>
    %c0_73 = arith.constant 0 : index
    %c256_74 = arith.constant 256 : index
    %72 = vector.load %arg16[%c0_73, %c256_74] : memref<1x1280xf32, #tpu.memory_space<vmem>>, vector<1x128xf32>
    tpu.vector_store %arg16[%c0_73, %c256_74], %71 {strides = array<i32>} : memref<1x1280xf32, #tpu.memory_space<vmem>>, vector<1x128xf32>,
    %c9_75 = arith.constant 9 : index
    %c0_76 = arith.constant 0 : index
    %73 = vector.load %arg15[%c9_75, %c0_76] : memref<30x128xf32, #tpu.memory_space<vmem>>, vector<3x128xf32>
    %cst_77 = arith.constant dense<0xFF800000> : vector<128xf32>
    %74 = vector.multi_reduction <maximumf>, %73, %cst_77 [0] : vector<3x128xf32> to vector<128xf32>
    %75 = vector.shape_cast %74 : vector<128xf32> to vector<1x128xf32>
    %c0_78 = arith.constant 0 : index
    %c384 = arith.constant 384 : index
    %76 = vector.load %arg16[%c0_78, %c384] : memref<1x1280xf32, #tpu.memory_space<vmem>>, vector<1x128xf32>
    tpu.vector_store %arg16[%c0_78, %c384], %75 {strides = array<i32>} : memref<1x1280xf32, #tpu.memory_space<vmem>>, vector<1x128xf32>,
    %c12 = arith.constant 12 : index
    %c0_79 = arith.constant 0 : index
    %77 = vector.load %arg15[%c12, %c0_79] : memref<30x128xf32, #tpu.memory_space<vmem>>, vector<3x128xf32>
    %cst_80 = arith.constant dense<0xFF800000> : vector<128xf32>
    %78 = vector.multi_reduction <maximumf>, %77, %cst_80 [0] : vector<3x128xf32> to vector<128xf32>
    %79 = vector.shape_cast %78 : vector<128xf32> to vector<1x128xf32>
    %c0_81 = arith.constant 0 : index
    %c512 = arith.constant 512 : index
    %80 = vector.load %arg16[%c0_81, %c512] : memref<1x1280xf32, #tpu.memory_space<vmem>>, vector<1x128xf32>
    tpu.vector_store %arg16[%c0_81, %c512], %79 {strides = array<i32>} : memref<1x1280xf32, #tpu.memory_space<vmem>>, vector<1x128xf32>,
    %c15 = arith.constant 15 : index
    %c0_82 = arith.constant 0 : index
    %81 = vector.load %arg15[%c15, %c0_82] : memref<30x128xf32, #tpu.memory_space<vmem>>, vector<3x128xf32>
    %cst_83 = arith.constant dense<0xFF800000> : vector<128xf32>
    %82 = vector.multi_reduction <maximumf>, %81, %cst_83 [0] : vector<3x128xf32> to vector<128xf32>
    %83 = vector.shape_cast %82 : vector<128xf32> to vector<1x128xf32>
    %c0_84 = arith.constant 0 : index
    %c640 = arith.constant 640 : index
    %84 = vector.load %arg16[%c0_84, %c640] : memref<1x1280xf32, #tpu.memory_space<vmem>>, vector<1x128xf32>
    tpu.vector_store %arg16[%c0_84, %c640], %83 {strides = array<i32>} : memref<1x1280xf32, #tpu.memory_space<vmem>>, vector<1x128xf32>,
    %c18 = arith.constant 18 : index
    %c0_85 = arith.constant 0 : index
    %85 = vector.load %arg15[%c18, %c0_85] : memref<30x128xf32, #tpu.memory_space<vmem>>, vector<3x128xf32>
    %cst_86 = arith.constant dense<0xFF800000> : vector<128xf32>
    %86 = vector.multi_reduction <maximumf>, %85, %cst_86 [0] : vector<3x128xf32> to vector<128xf32>
    %87 = vector.shape_cast %86 : vector<128xf32> to vector<1x128xf32>
    %c0_87 = arith.constant 0 : index
    %c768 = arith.constant 768 : index
    %88 = vector.load %arg16[%c0_87, %c768] : memref<1x1280xf32, #tpu.memory_space<vmem>>, vector<1x128xf32>
    tpu.vector_store %arg16[%c0_87, %c768], %87 {strides = array<i32>} : memref<1x1280xf32, #tpu.memory_space<vmem>>, vector<1x128xf32>,
    %c21 = arith.constant 21 : index
    %c0_88 = arith.constant 0 : index
    %89 = vector.load %arg15[%c21, %c0_88] : memref<30x128xf32, #tpu.memory_space<vmem>>, vector<3x128xf32>
    %cst_89 = arith.constant dense<0xFF800000> : vector<128xf32>
    %90 = vector.multi_reduction <maximumf>, %89, %cst_89 [0] : vector<3x128xf32> to vector<128xf32>
    %91 = vector.shape_cast %90 : vector<128xf32> to vector<1x128xf32>
    %c0_90 = arith.constant 0 : index
    %c896 = arith.constant 896 : index
    %92 = vector.load %arg16[%c0_90, %c896] : memref<1x1280xf32, #tpu.memory_space<vmem>>, vector<1x128xf32>
    tpu.vector_store %arg16[%c0_90, %c896], %91 {strides = array<i32>} : memref<1x1280xf32, #tpu.memory_space<vmem>>, vector<1x128xf32>,
    %c24 = arith.constant 24 : index
    %c0_91 = arith.constant 0 : index
    %93 = vector.load %arg15[%c24, %c0_91] : memref<30x128xf32, #tpu.memory_space<vmem>>, vector<3x128xf32>
    %cst_92 = arith.constant dense<0xFF800000> : vector<128xf32>
    %94 = vector.multi_reduction <maximumf>, %93, %cst_92 [0] : vector<3x128xf32> to vector<128xf32>
    %95 = vector.shape_cast %94 : vector<128xf32> to vector<1x128xf32>
    %c0_93 = arith.constant 0 : index
    %c1024 = arith.constant 1024 : index
    %96 = vector.load %arg16[%c0_93, %c1024] : memref<1x1280xf32, #tpu.memory_space<vmem>>, vector<1x128xf32>
    tpu.vector_store %arg16[%c0_93, %c1024], %95 {strides = array<i32>} : memref<1x1280xf32, #tpu.memory_space<vmem>>, vector<1x128xf32>,
    %c27 = arith.constant 27 : index
    %c0_94 = arith.constant 0 : index
    %97 = vector.load %arg15[%c27, %c0_94] : memref<30x128xf32, #tpu.memory_space<vmem>>, vector<3x128xf32>
    %cst_95 = arith.constant dense<0xFF800000> : vector<128xf32>
    %98 = vector.multi_reduction <maximumf>, %97, %cst_95 [0] : vector<3x128xf32> to vector<128xf32>
    %99 = vector.shape_cast %98 : vector<128xf32> to vector<1x128xf32>
    %c0_96 = arith.constant 0 : index
    %c1152 = arith.constant 1152 : index
    %100 = vector.load %arg16[%c0_96, %c1152] : memref<1x1280xf32, #tpu.memory_space<vmem>>, vector<1x128xf32>
    tpu.vector_store %arg16[%c0_96, %c1152], %99 {strides = array<i32>} : memref<1x1280xf32, #tpu.memory_space<vmem>>, vector<1x128xf32>,
    %c0_97 = arith.constant 0 : index
    %c0_98 = arith.constant 0 : index
    %101 = vector.load %arg16[%c0_97, %c0_98] : memref<1x1280xf32, #tpu.memory_space<vmem>>, vector<1x1280xf32>
    %102 = arith.truncf %101 : vector<1x1280xf32> to vector<1x1280xbf16>
    %c0_99 = arith.constant 0 : index
    %c0_100 = arith.constant 0 : index
    %103 = vector.load %arg6[%c0_99, %c0_100] : memref<1280x128xbf16, #tpu.memory_space<vmem>>, vector<1280x128xbf16>
    %cst_101 = arith.constant dense<0.000000e+00> : vector<1x128xf32>
    %104 = tpu.matmul %102, %103, %cst_101 {dimension_numbers = #tpu.dot_dimension_numbers<[1], [0], [0], [1], [0, 0, 1, 1], [], []>} : vector<1x1280xbf16>, vector<1280x128xbf16>, vector<1x128xf32> -> vector<1x128xf32>
    %c0_102 = arith.constant 0 : index
    %c0_103 = arith.constant 0 : index
    %105 = vector.load %arg7[%c0_102, %c0_103] : memref<1x128xf32, #tpu.memory_space<vmem>>, vector<1x128xf32>
    %106 = arith.addf %104, %105 : vector<1x128xf32>
    %cst_104 = arith.constant 0.000000e+00 : f32
    %107 = vector.broadcast %cst_104 : f32 to vector<1x128xf32>
    %108 = arith.maximumf %106, %107 : vector<1x128xf32>
    %109 = arith.truncf %108 : vector<1x128xf32> to vector<1x128xbf16>
    %c0_105 = arith.constant 0 : index
    %c0_106 = arith.constant 0 : index
    %110 = vector.load %arg8[%c0_105, %c0_106] : memref<128x2xbf16, #tpu.memory_space<vmem>>, vector<128x2xbf16>
    %cst_107 = arith.constant dense<0.000000e+00> : vector<1x2xf32>
    %111 = tpu.matmul %109, %110, %cst_107 {dimension_numbers = #tpu.dot_dimension_numbers<[1], [0], [0], [1], [0, 0, 1, 1], [], []>} : vector<1x128xbf16>, vector<128x2xbf16>, vector<1x2xf32> -> vector<1x2xf32>
    %c0_108 = arith.constant 0 : index
    %c0_109 = arith.constant 0 : index
    %112 = vector.load %arg9[%c0_108, %c0_109] : memref<1x2xf32, #tpu.memory_space<vmem>>, vector<1x2xf32>
    %113 = arith.addf %111, %112 : vector<1x2xf32>
    %cst_110 = arith.constant dense<0xFF800000> : vector<1xf32>
    %114 = vector.multi_reduction <maximumf>, %113, %cst_110 [1] : vector<1x2xf32> to vector<1xf32>
    %115 = vector.shape_cast %114 : vector<1xf32> to vector<1x1xf32>
    %116 = vector.broadcast %115 : vector<1x1xf32> to vector<1x2xf32>
    %117 = arith.subf %113, %116 : vector<1x2xf32>
    %118 = math.exp %117 : vector<1x2xf32>
    %cst_111 = arith.constant dense<0.000000e+00> : vector<1xf32>
    %119 = vector.multi_reduction <add>, %118, %cst_111 [1] : vector<1x2xf32> to vector<1xf32>
    %120 = vector.shape_cast %119 : vector<1xf32> to vector<1x1xf32>
    %121 = vector.broadcast %120 : vector<1x1xf32> to vector<1x2xf32>
    %122 = arith.divf %118, %121 : vector<1x2xf32>
    %c0_112 = arith.constant 0 : index
    %c0_113 = arith.constant 0 : index
    %c0_114 = arith.constant 0 : index
    %123 = vector.load %arg10[%c0_112, %c0_113, %c0_114] : memref<1x1x2xf32, #tpu.memory_space<vmem>>, vector<1x1x2xf32>
    %124 = vector.shape_cast %123 : vector<1x1x2xf32> to vector<1x2xf32>
    %125 = vector.shape_cast %122 : vector<1x2xf32> to vector<1x1x2xf32>
    tpu.vector_store %arg10[%c0_112, %c0_113, %c0_114], %125 {strides = array<i32>} : memref<1x1x2xf32, #tpu.memory_space<vmem>>, vector<1x1x2xf32>,
    return
  }
  func.func @transform_0(%arg0: i32) -> (i32, i32, i32) {
    %c0_i32 = arith.constant 0 : i32
    %c0_i32_0 = arith.constant 0 : i32
    %c0_i32_1 = arith.constant 0 : i32
    return %arg0, %c0_i32, %c0_i32_0 : i32, i32, i32
  }
  func.func @transform_1(%arg0: i32) -> (i32, i32) {
    %c0_i32 = arith.constant 0 : i32
    %c0_i32_0 = arith.constant 0 : i32
    %c0_i32_1 = arith.constant 0 : i32
    return %c0_i32, %c0_i32_0 : i32, i32
  }
  func.func @transform_2(%arg0: i32) -> (i32, i32) {
    %c0_i32 = arith.constant 0 : i32
    %c0_i32_0 = arith.constant 0 : i32
    %c0_i32_1 = arith.constant 0 : i32
    return %c0_i32, %c0_i32_0 : i32, i32
  }
  func.func @transform_3(%arg0: i32) -> (i32, i32) {
    %c0_i32 = arith.constant 0 : i32
    %c0_i32_0 = arith.constant 0 : i32
    %c0_i32_1 = arith.constant 0 : i32
    return %c0_i32, %c0_i32_0 : i32, i32
  }
  func.func @transform_4(%arg0: i32) -> (i32, i32) {
    %c0_i32 = arith.constant 0 : i32
    %c0_i32_0 = arith.constant 0 : i32
    %c0_i32_1 = arith.constant 0 : i32
    return %c0_i32, %c0_i32_0 : i32, i32
  }
  func.func @transform_5(%arg0: i32) -> (i32, i32) {
    %c0_i32 = arith.constant 0 : i32
    %c0_i32_0 = arith.constant 0 : i32
    %c0_i32_1 = arith.constant 0 : i32
    return %c0_i32, %c0_i32_0 : i32, i32
  }
  func.func @transform_6(%arg0: i32) -> (i32, i32) {
    %c0_i32 = arith.constant 0 : i32
    %c0_i32_0 = arith.constant 0 : i32
    %c0_i32_1 = arith.constant 0 : i32
    return %c0_i32, %c0_i32_0 : i32, i32
  }
  func.func @transform_7(%arg0: i32) -> (i32, i32) {
    %c0_i32 = arith.constant 0 : i32
    %c0_i32_0 = arith.constant 0 : i32
    %c0_i32_1 = arith.constant 0 : i32
    return %c0_i32, %c0_i32_0 : i32, i32
  }
  func.func @transform_8(%arg0: i32) -> (i32, i32) {
    %c0_i32 = arith.constant 0 : i32
    %c0_i32_0 = arith.constant 0 : i32
    %c0_i32_1 = arith.constant 0 : i32
    return %c0_i32, %c0_i32_0 : i32, i32
  }
  func.func @transform_9(%arg0: i32) -> (i32, i32, i32) {
    %c0_i32 = arith.constant 0 : i32
    %c0_i32_0 = arith.constant 0 : i32
    %c0_i32_1 = arith.constant 0 : i32
    return %arg0, %c0_i32, %c0_i32_0 : i32, i32, i32
  }
}

</mosaic_0001>

<bundles_post_ra>
// kernel: cnn_forward_fused.1
= control target key start
LH: loop header
LB: loop body
LE: loop exit
PB: predicated region body
PF: predicated region fallthrough
CT: control target
= control target key end

     0   :  { %14 = vsyncpa [#allocation9], 0  ;;  %s4703_s0 = inlined_call_operand.vmem [shape: f32[2,362,64], index: 0, kind: input, shape index: {}]   ;;  %s4704_s1 = inlined_call_operand.vmem [shape: bf16[192,128], index: 1, kind: input, shape index: {}]   ;;  %s4705_s2 = inlined_call_operand.vmem [shape: f32[1,128], index: 2, kind: input, shape index: {}]   ;;  %s4706_s3 = inlined_call_operand.vmem [shape: bf16[384,128], index: 3, kind: input, shape index: {}]   ;;  %s4707_s4 = inlined_call_operand.vmem [shape: f32[1,128], index: 4, kind: input, shape index: {}]   ;;  %s4708_s5 = inlined_call_operand.vmem [shape: bf16[1280,128], index: 5, kind: input, shape index: {}]   ;;  %s4709_s6 = inlined_call_operand.vmem [shape: f32[1,128], index: 6, kind: input, shape index: {}]   ;;  %s4710_s7 = inlined_call_operand.vmem [shape: bf16[128,2], index: 7, kind: input, shape index: {}]   ;;  %s4711_s8 = inlined_call_operand.vmem [shape: f32[1,2], index: 8, kind: input, shape index: {}]   ;;  %s4712_s9 = inlined_call_operand.hbm [shape: f32[2,1,2], index: 9, kind: output, shape index: {}]  }
   0x1   :  { %16 = vsyncpa [#allocation9 + $0x1], 0  ;;  %s3724_s30 = smov 0   ;;  %s3726_s10 = smov 0  }
   0x2   :  { %s3728_s11 = smov 0   ;;  %s3730_s12 = smov 0  }
   0x3 LB: > { %s3745_s13 = sadd.s32 4294967295, %s3667_s12   ;;  %s3079_s14 = sadd.s32 4294967294, %s3667_s12   ;;  %s3667_s12 = sphi %s3730_s12, %s4720_s12   ;;  %s3663_s11 = sphi %s3728_s11, %s4719_s11   ;;  %s3659_s10 = sphi %s3726_s10, %s4718_s10   ;;  %s3655_s30 = sphi %s3724_s30, %s4717_s30  }
   0x4   : > { %s3749_s15 = sadd.s32 1, %s3667_s12   ;;  %s223_s16 = sadd.s32 1, %s3663_s11 }
   0x5   : > { %s220_s17 = ssub.s32 %s3667_s12, %s3749_s15  ;;  %p233_p0 = scmp.ne.s32.totalorder %s3663_s11, %s3659_s10 }
   0x6   : > { %p221_p1 = scmp.eq.s32.totalorder %s220_s17, 0  ;;  %p234_p2 = scmp.eq.s32.totalorder %s3745_s13, 1 }
   0x7   : > { %p239_p3 = scmp.ne.s32.totalorder %s3659_s10, %s3655_s30  ;;  %p240_p4 = scmp.eq.s32.totalorder %s3079_s14, 1 }
   0x8   : > { %s3760_s18 = scalar_select %p221_p1, %s3663_s11, %s223_s16  }
   0x9   : > { %p3762_p5 = por %p234_p2, %p233_p0  ;;  %p3766_p6 = por %p240_p4, %p239_p3 }
   0xa   : > { %p3082_p7 = scmp.ge.s32.totalorder %s3667_s12, 1  ;;  %p290_p8 = scmp.lt.s32.totalorder %s3667_s12, 3 }
   0xc   : > { %p291_p9 = pnand %p3082_p7, %p290_p8 }
   0xd   : > { %p325_p10 = scmp.lt.s32.totalorder (!%p291_p9), %s3745_s13, 1  ;;  %v3477_v0 = vld [vmem:[%s4704_s1] sm:$0xff] (!%p291_p9)   ;;  %v3669_v1 = vmov (!%p291_p9), 0   ;;  %v3478_v2 = vld [vmem:[%s4704_s1 + $0x8] sm:$0xff] (!%p291_p9)   ;;  %v3479_v3 = vld [vmem:[%s4704_s1 + $0x10] sm:$0xff] (!%p291_p9)   ;;  %s3670_s17 = smov (!%p291_p9), 64  }
   0xe   : > { %294 = sbr.rel (%p291_p9) target bundleno = 1753 (0x6d9), region = 56  ;;  %1091 = vmatprep.subr.bf16.mxu0 (!%p291_p9), %v3669_v1  ;;  %v3480_v8 = vld [vmem:[%s4704_s1 + $0x18] sm:$0xff] (!%p291_p9)   ;;  %v3481_v11 = vld [vmem:[%s4704_s1 + $0x20] sm:$0xff] (!%p291_p9)   ;;  %vm376_vm0 = vcmask (!%p291_p9), 523264   ;;  %v3482_v14 = vld [vmem:[%s4704_s1 + $0x28] sm:$0xff] (!%p291_p9)   ;;  %vm647_vm1 = vcmask (!%p291_p9), 1048064  }
   0xf   : > { %1092 = vmatpush1.bf16.msra.mxu0 (!%p291_p9), %v3477_v0  ;;  %v3483_v18 = vld [vmem:[%s4704_s1 + $0x30] sm:$0xff] (!%p291_p9)   ;;  %v3484_v24 = vld [vmem:[%s4704_s1 + $0x38] sm:$0xff] (!%p291_p9)   ;;  %v3485_v33 = vld [vmem:[%s4704_s1 + $0x40] sm:$0xff] (!%p291_p9)   ;;  %vm1892_vm2 = vcmask (!%p291_p9), 1042432   ;;  %vm3672_vm4 = vmmov (!%p291_p9), 0   ;;  %vm2998_vm5 = vcmask (!%p291_p9), 8192  }
  0x10   : > { %1093 = vmatprep.subr.bf16.mxu0 (!%p291_p9), %v3669_v1  ;;  %v3486_v43 = vld [vmem:[%s4704_s1 + $0x48] sm:$0xff] (!%p291_p9)   ;;  %v3487_v56 = vld [vmem:[%s4704_s1 + $0x50] sm:$0xff] (!%p291_p9)   ;;  %v3488_v59 = vld [vmem:[%s4704_s1 + $0x58] sm:$0xff] (!%p291_p9)   ;;  %s323_s21 = sand.u32 (!%p291_p9), 1, %s3659_s10   ;;  %s3233_s22 = sshll.u32 (!%p291_p9), %s3745_s13, 4 }
  0x11   : > { %s4660_s27 = scalar_lea.hbm (!%p291_p9), %s4712_s9, %s3233_s22  ;;  %s3012_s28 = scalar_lea.sflag (!%p291_p9), [#allocation9], %s323_s21 }
  0x13   : > { %1094 = vmatpush1.bf16.msra.mxu0 (!%p291_p9), %v3478_v2 }
  0x14   : > { %1095 = vmatprep.subr.bf16.mxu0 (!%p291_p9), %v3669_v1 }
  0x15   : > { %s326_s23 = scalar_select %p325_p10, %s3745_s13, 1 }
  0x16   : > { %s3673_s13 = smov [#allocation8]  }
  0x17   : > { %s3433_s26 = smul.u32 368, %s326_s23  ;;  %1096 = vmatpush1.bf16.msra.mxu0 %v3479_v3  ;;  %s324_s23 = scalar_lea.vmem [#allocation8], %s323_s21 }
  0x18   : > { %1097 = vmatprep.subr.bf16.mxu0 %v3669_v1  ;;  %s3024_s24 = sshll.u32 %s324_s23, 4  ;;  %s4662_s24 = int_to_ptr.vmem [resolvable:$true] %s3024_s24 }
  0x19   : > { %s3785_s29 = scalar_lea.vmem %s4703_s0, %s3433_s26 }
  0x1a   : > { %v422_v4 = vld [vmem:[%s3785_s29 + $0x1] sm:$0xff]  ;;  %v424_v5 = vld [vmem:[%s3785_s29 + $0x11] sm:$0xff]  ;;  %v423_v6 = vld [vmem:[%s3785_s29 + $0x9] sm:$0xff] }
  0x1b   : > { %512 = vrot.lane.b32.xlu0 %v422_v4, %s3670_s17  ;;  %516 = vrot.lane.b32.xlu1 %v424_v5, %s3670_s17  ;;  %v425_v7 = vld [vmem:[%s3785_s29 + $0x19] sm:$0xff]  ;;  %v427_v9 = vld [vmem:[%s3785_s29 + $0x29] sm:$0xff] }
  0x1c   : > { %v426_v10 = vld [vmem:[%s3785_s29 + $0x21] sm:$0xff]  ;;  %1098 = vmatpush1.bf16.msra.mxu0 %v3480_v8  ;;  %v429_v12 = vld [vmem:[%s3785_s29 + $0x39] sm:$0xff]  ;;  %v428_v13 = vld [vmem:[%s3785_s29 + $0x31] sm:$0xff] }
  0x1d   : > { %1099 = vmatprep.subr.bf16.mxu0 %v3669_v1  ;;  %v331_v15 = vld [vmem:[%s3785_s29] sm:$0xff]  ;;  %v431_v16 = vld [vmem:[%s3785_s29 + $0x49] sm:$0xff]  ;;  %v334_v21 = vld [vmem:[%s3785_s29 + $0x18] sm:$0xff] }
  0x1e   : > { %v430_v17 = vld [vmem:[%s3785_s29 + $0x41] sm:$0xff]  ;;  %377 = vst.msk [vmem:[#allocation2] sm:$0xff] %vm376_vm0, %v331_v15  ;;  %v333_v19 = vld [vmem:[%s3785_s29 + $0x10] sm:$0xff]  ;;  %v433_v22 = vld [vmem:[%s3785_s29 + $0x59] sm:$0xff] }
  0x1f   : > { %514 = vrot.lane.b32.xlu0 %v423_v6, %s3670_s17  ;;  %518 = vrot.lane.b32.xlu1 %v425_v7, %s3670_s17  ;;  %v332_v20 = vld [vmem:[%s3785_s29 + $0x8] sm:$0xff]  ;;  %379 = vst.msk [vmem:[#allocation2 + $0x20] sm:$0xff] %vm376_vm0, %v333_v19  ;;  %380 = vst.msk [vmem:[#allocation2 + $0x30] sm:$0xff] %vm376_vm0, %v334_v21  ;;  %v432_v23 = vld [vmem:[%s3785_s29 + $0x51] sm:$0xff] }
  0x20   : > { %1100 = vmatpush1.bf16.msra.mxu0 %v3481_v11  ;;  %378 = vst.msk [vmem:[#allocation2 + $0x10] sm:$0xff] %vm376_vm0, %v332_v20  ;;  %v693_v25 = vld [vmem:[%s3785_s29 + $0x2] sm:$0xff]  ;;  %v694_v26 = vld [vmem:[%s3785_s29 + $0xa] sm:$0xff]  ;;  %v695_v30 = vld [vmem:[%s3785_s29 + $0x12] sm:$0xff] }
  0x21   : > { %1101 = vmatprep.subr.bf16.mxu0 %v3669_v1  ;;  %v435_v27 = vld [vmem:[%s3785_s29 + $0x69] sm:$0xff]  ;;  %738 = vst.msk [vmem:[#allocation2 + $0x8] sm:$0xff] %vm376_vm0, %v693_v25  ;;  %739 = vst.msk [vmem:[#allocation2 + $0x18] sm:$0xff] %vm376_vm0, %v694_v26  ;;  %v335_v29 = vld [vmem:[%s3785_s29 + $0x20] sm:$0xff] }
  0x22   : > { %v336_v28 = vld [vmem:[%s3785_s29 + $0x28] sm:$0xff]  ;;  %381 = vst.msk [vmem:[#allocation2 + $0x40] sm:$0xff] %vm376_vm0, %v335_v29  ;;  %v696_v31 = vld [vmem:[%s3785_s29 + $0x1a] sm:$0xff]  ;;  %740 = vst.msk [vmem:[#allocation2 + $0x28] sm:$0xff] %vm376_vm0, %v695_v30 }
  0x23   : > { %522 = vrot.lane.b32.xlu1 %v427_v9, %s3670_s17  ;;  %520 = vrot.lane.b32.xlu0 %v426_v10, %s3670_s17  ;;  %382 = vst.msk [vmem:[#allocation2 + $0x50] sm:$0xff] %vm376_vm0, %v336_v28  ;;  %v434_v32 = vld [vmem:[%s3785_s29 + $0x61] sm:$0xff]  ;;  %741 = vst.msk [vmem:[#allocation2 + $0x38] sm:$0xff] %vm376_vm0, %v696_v31  ;;  %v338_v34 = vld [vmem:[%s3785_s29 + $0x38] sm:$0xff] }
  0x24   : > { %1102 = vmatpush1.bf16.msra.mxu0 %v3482_v14  ;;  %384 = vst.msk [vmem:[#allocation2 + $0x70] sm:$0xff] %vm376_vm0, %v338_v34  ;;  %v337_v35 = vld [vmem:[%s3785_s29 + $0x30] sm:$0xff]  ;;  %v697_v36 = vld [vmem:[%s3785_s29 + $0x22] sm:$0xff]  ;;  %v437_v38 = vld [vmem:[%s3785_s29 + $0x79] sm:$0xff] }
  0x25   : > { %1103 = vmatprep.subr.bf16.mxu0 %v3669_v1  ;;  %v698_v37 = vld [vmem:[%s3785_s29 + $0x2a] sm:$0xff]  ;;  %383 = vst.msk [vmem:[#allocation2 + $0x60] sm:$0xff] %vm376_vm0, %v337_v35  ;;  %742 = vst.msk [vmem:[#allocation2 + $0x48] sm:$0xff] %vm376_vm0, %v697_v36  ;;  %v339_v40 = vld [vmem:[%s3785_s29 + $0x40] sm:$0xff] }
  0x26   : > { %743 = vst.msk [vmem:[#allocation2 + $0x58] sm:$0xff] %vm376_vm0, %v698_v37  ;;  %v340_v39 = vld [vmem:[%s3785_s29 + $0x48] sm:$0xff]  ;;  %v699_v41 = vld [vmem:[%s3785_s29 + $0x32] sm:$0xff]  ;;  %385 = vst.msk [vmem:[#allocation2 + $0x80] sm:$0xff] %vm376_vm0, %v339_v40 }
  0x27   : > { %526 = vrot.lane.b32.xlu1 %v429_v12, %s3670_s17  ;;  %524 = vrot.lane.b32.xlu0 %v428_v13, %s3670_s17  ;;  %386 = vst.msk [vmem:[#allocation2 + $0x90] sm:$0xff] %vm376_vm0, %v340_v39  ;;  %v436_v42 = vld [vmem:[%s3785_s29 + $0x71] sm:$0xff]  ;;  %v700_v44 = vld [vmem:[%s3785_s29 + $0x3a] sm:$0xff]  ;;  %744 = vst.msk [vmem:[#allocation2 + $0x68] sm:$0xff] %vm376_vm0, %v699_v41 }
  0x28   : > { %1104 = vmatpush1.bf16.msra.mxu0 %v3483_v18  ;;  %v784_v45 = vld [vmem:[#allocation2 + $0x8] sm:$0xff]  ;;  %v786_v46 = vld [vmem:[#allocation2 + $0x18] sm:$0xff]  ;;  %745 = vst.msk [vmem:[#allocation2 + $0x78] sm:$0xff] %vm376_vm0, %v700_v44  ;;  %v341_v50 = vld [vmem:[%s3785_s29 + $0x50] sm:$0xff] }
  0x29   : > { %1105 = vmatprep.subr.bf16.mxu0 %v3669_v1  ;;  %v342_v47 = vld [vmem:[%s3785_s29 + $0x58] sm:$0xff]  ;;  %v439_v48 = vld [vmem:[%s3785_s29 + $0x89] sm:$0xff]  ;;  %v874_v49 = vpack.c.bf16 %v786_v46, %v784_v45  ;;  %v438_v53 = vld [vmem:[%s3785_s29 + $0x81] sm:$0xff]  ;;  %387 = vst.msk [vmem:[#allocation2 + $0xa0] sm:$0xff] %vm376_vm0, %v341_v50 }
  0x2a   : > { %388 = vst.msk [vmem:[#allocation2 + $0xb0] sm:$0xff] %vm376_vm0, %v342_v47  ;;  %v701_v51 = vld [vmem:[%s3785_s29 + $0x42] sm:$0xff]  ;;  %v702_v52 = vld [vmem:[%s3785_s29 + $0x4a] sm:$0xff]  ;;  %v703_v54 = vld [vmem:[%s3785_s29 + $0x52] sm:$0xff] }
  0x2b   : > { %530 = vrot.lane.b32.xlu1 %v431_v16, %s3670_s17  ;;  %528 = vrot.lane.b32.xlu0 %v430_v17, %s3670_s17  ;;  %746 = vst.msk [vmem:[#allocation2 + $0x88] sm:$0xff] %vm376_vm0, %v701_v51  ;;  %747 = vst.msk [vmem:[#allocation2 + $0x98] sm:$0xff] %vm376_vm0, %v702_v52  ;;  %v704_v55 = vld [vmem:[%s3785_s29 + $0x5a] sm:$0xff]  ;;  %v440_v58 = vld [vmem:[%s3785_s29 + $0x91] sm:$0xff] }
  0x2c   : > { %1106 = vmatpush1.bf16.msra.mxu0 %v3484_v24  ;;  %3097 = vmatprep.mubr.msk.bf16.mxu0 %vm376_vm0, %v874_v49  ;;  %748 = vst.msk [vmem:[#allocation2 + $0xa8] sm:$0xff] %vm376_vm0, %v703_v54  ;;  %749 = vst.msk [vmem:[#allocation2 + $0xb8] sm:$0xff] %vm376_vm0, %v704_v55  ;;  %v441_v57 = vld [vmem:[%s3785_s29 + $0x99] sm:$0xff]  ;;  %v344_v60 = vld [vmem:[%s3785_s29 + $0x68] sm:$0xff] }
  0x2d   : > { %1107 = vmatprep.subr.bf16.mxu0 %v3669_v1  ;;  %v343_v61 = vld [vmem:[%s3785_s29 + $0x60] sm:$0xff]  ;;  %390 = vst.msk [vmem:[#allocation2 + $0xd0] sm:$0xff] %vm376_vm0, %v344_v60  ;;  %v443_v62 = vld [vmem:[%s3785_s29 + $0xa9] sm:$0xff]  ;;  %v444_v3 = vld [vmem:[%s3785_s29 + $0xb1] sm:$0xff] }
  0x2e   : > { %389 = vst.msk [vmem:[#allocation2 + $0xc0] sm:$0xff] %vm376_vm0, %v343_v61  ;;  %v442_v63 = vld [vmem:[%s3785_s29 + $0xa1] sm:$0xff]  ;;  %v706_v2 = vld [vmem:[%s3785_s29 + $0x6a] sm:$0xff]  ;;  %v346_v4 = vld [vmem:[%s3785_s29 + $0x78] sm:$0xff] }
  0x2f   : > { %534 = vrot.lane.b32.xlu1 %v433_v22, %s3670_s17  ;;  %532 = vrot.lane.b32.xlu0 %v432_v23, %s3670_s17  ;;  %v705_v0 = vld [vmem:[%s3785_s29 + $0x62] sm:$0xff]  ;;  %751 = vst.msk [vmem:[#allocation2 + $0xd8] sm:$0xff] %vm376_vm0, %v706_v2  ;;  %392 = vst.msk [vmem:[#allocation2 + $0xf0] sm:$0xff] %vm376_vm0, %v346_v4  ;;  %v345_v5 = vld [vmem:[%s3785_s29 + $0x70] sm:$0xff] }
  0x30   : > { %1108 = vmatpush1.bf16.msra.mxu0 %v3485_v33  ;;  %750 = vst.msk [vmem:[#allocation2 + $0xc8] sm:$0xff] %vm376_vm0, %v705_v0  ;;  %v447_v6 = vld [vmem:[%s3785_s29 + $0xc9] sm:$0xff]  ;;  %391 = vst.msk [vmem:[#allocation2 + $0xe0] sm:$0xff] %vm376_vm0, %v345_v5  ;;  %v446_v7 = vld [vmem:[%s3785_s29 + $0xc1] sm:$0xff] }
  0x31   : > { %1109 = vmatprep.subr.bf16.mxu0 %v3669_v1  ;;  %v707_v8 = vld [vmem:[%s3785_s29 + $0x72] sm:$0xff]  ;;  %v708_v9 = vld [vmem:[%s3785_s29 + $0x7a] sm:$0xff]  ;;  %v348_v12 = vld [vmem:[%s3785_s29 + $0x88] sm:$0xff] }
  0x32   : > { %752 = vst.msk [vmem:[#allocation2 + $0xe8] sm:$0xff] %vm376_vm0, %v707_v8  ;;  %753 = vst.msk [vmem:[#allocation2 + $0xf8] sm:$0xff] %vm376_vm0, %v708_v9  ;;  %v449_v10 = vld [vmem:[%s3785_s29 + $0xd9] sm:$0xff]  ;;  %v448_v11 = vld [vmem:[%s3785_s29 + $0xd1] sm:$0xff] }
  0x33   : > { %538 = vrot.lane.b32.xlu1 %v435_v27, %s3670_s17  ;;  %536 = vrot.lane.b32.xlu0 %v434_v32, %s3670_s17  ;;  %v347_v13 = vld [vmem:[%s3785_s29 + $0x80] sm:$0xff]  ;;  %394 = vst.msk [vmem:[#allocation2 + $0x110] sm:$0xff] %vm376_vm0, %v348_v12  ;;  %v451_v14 = vld [vmem:[%s3785_s29 + $0xe9] sm:$0xff] }
  0x34   : > { %1110 = vmatpush1.bf16.msra.mxu0 %v3486_v43  ;;  %393 = vst.msk [vmem:[#allocation2 + $0x100] sm:$0xff] %vm376_vm0, %v347_v13  ;;  %v450_v15 = vld [vmem:[%s3785_s29 + $0xe1] sm:$0xff]  ;;  %v710_v17 = vld [vmem:[%s3785_s29 + $0x8a] sm:$0xff]  ;;  %v453_v18 = vld [vmem:[%s3785_s29 + $0xf9] sm:$0xff] }
  0x35   : > { %1111 = vmatprep.subr.bf16.mxu0 %v3669_v1  ;;  %v709_v16 = vld [vmem:[%s3785_s29 + $0x82] sm:$0xff]  ;;  %v452_v19 = vld [vmem:[%s3785_s29 + $0xf1] sm:$0xff]  ;;  %755 = vst.msk [vmem:[#allocation2 + $0x118] sm:$0xff] %vm376_vm0, %v710_v17  ;;  %v712_v25 = vld [vmem:[%s3785_s29 + $0x9a] sm:$0xff] }
  0x36   : > { %754 = vst.msk [vmem:[#allocation2 + $0x108] sm:$0xff] %vm376_vm0, %v709_v16  ;;  %v350_v20 = vld [vmem:[%s3785_s29 + $0x98] sm:$0xff]  ;;  %v349_v21 = vld [vmem:[%s3785_s29 + $0x90] sm:$0xff]  ;;  %v454_v23 = vld [vmem:[%s3785_s29 + $0x101] sm:$0xff] }
  0x37   : > { %542 = vrot.lane.b32.xlu1 %v437_v38, %s3670_s17  ;;  %540 = vrot.lane.b32.xlu0 %v436_v42, %s3670_s17  ;;  %396 = vst.msk [vmem:[#allocation2 + $0x130] sm:$0xff] %vm376_vm0, %v350_v20  ;;  %395 = vst.msk [vmem:[#allocation2 + $0x120] sm:$0xff] %vm376_vm0, %v349_v21  ;;  %v455_v22 = vld [vmem:[%s3785_s29 + $0x109] sm:$0xff]  ;;  %v711_v24 = vld [vmem:[%s3785_s29 + $0x92] sm:$0xff] }
  0x38   : > { %1112 = vmatpush1.bf16.msra.mxu0 %v3487_v56  ;;  %756 = vst.msk [vmem:[#allocation2 + $0x128] sm:$0xff] %vm376_vm0, %v711_v24  ;;  %757 = vst.msk [vmem:[#allocation2 + $0x138] sm:$0xff] %vm376_vm0, %v712_v25  ;;  %v457_v26 = vld [vmem:[%s3785_s29 + $0x119] sm:$0xff]  ;;  %v456_v27 = vld [vmem:[%s3785_s29 + $0x111] sm:$0xff] }
  0x39   : > { %1113 = vmatprep.subr.bf16.mxu0 %v3669_v1  ;;  %v445_v1 = vld [vmem:[%s3785_s29 + $0xb9] sm:$0xff]  ;;  %v352_v28 = vld [vmem:[%s3785_s29 + $0xa8] sm:$0xff]  ;;  %v460_v35 = vld [vmem:[%s3785_s29 + $0x131] sm:$0xff] }
  0x3a   : > { %v351_v29 = vld [vmem:[%s3785_s29 + $0xa0] sm:$0xff]  ;;  %398 = vst.msk [vmem:[#allocation2 + $0x150] sm:$0xff] %vm376_vm0, %v352_v28  ;;  %v459_v30 = vld [vmem:[%s3785_s29 + $0x129] sm:$0xff]  ;;  %v354_v36 = vld [vmem:[%s3785_s29 + $0xb8] sm:$0xff] }
  0x3b   : > { %546 = vrot.lane.b32.xlu1 %v439_v48, %s3670_s17  ;;  %544 = vrot.lane.b32.xlu0 %v438_v53, %s3670_s17  ;;  %397 = vst.msk [vmem:[#allocation2 + $0x140] sm:$0xff] %vm376_vm0, %v351_v29  ;;  %v458_v31 = vld [vmem:[%s3785_s29 + $0x121] sm:$0xff]  ;;  %v714_v33 = vld [vmem:[%s3785_s29 + $0xaa] sm:$0xff]  ;;  %400 = vst.msk [vmem:[#allocation2 + $0x170] sm:$0xff] %vm376_vm0, %v354_v36 }
  0x3c   : > { %1114 = vmatpush1.bf16.msra.mxu0 %v3488_v59  ;;  %v713_v32 = vld [vmem:[%s3785_s29 + $0xa2] sm:$0xff]  ;;  %v461_v34 = vld [vmem:[%s3785_s29 + $0x139] sm:$0xff]  ;;  %759 = vst.msk [vmem:[#allocation2 + $0x158] sm:$0xff] %vm376_vm0, %v714_v33  ;;  %v353_v37 = vld [vmem:[%s3785_s29 + $0xb0] sm:$0xff] }
  0x3d   : > { %758 = vst.msk [vmem:[#allocation2 + $0x148] sm:$0xff] %vm376_vm0, %v713_v32  ;;  %399 = vst.msk [vmem:[#allocation2 + $0x160] sm:$0xff] %vm376_vm0, %v353_v37  ;;  %v463_v38 = vld [vmem:[%s3785_s29 + $0x149] sm:$0xff]  ;;  %v462_v39 = vld [vmem:[%s3785_s29 + $0x141] sm:$0xff] }
  0x3e   : > { %v715_v40 = vld [vmem:[%s3785_s29 + $0xb2] sm:$0xff]  ;;  %v716_v41 = vld [vmem:[%s3785_s29 + $0xba] sm:$0xff]  ;;  %v356_v44 = vld [vmem:[%s3785_s29 + $0xc8] sm:$0xff] }
  0x3f   : > { %550 = vrot.lane.b32.xlu1 %v441_v57, %s3670_s17  ;;  %548 = vrot.lane.b32.xlu0 %v440_v58, %s3670_s17  ;;  %760 = vst.msk [vmem:[#allocation2 + $0x168] sm:$0xff] %vm376_vm0, %v715_v40  ;;  %761 = vst.msk [vmem:[#allocation2 + $0x178] sm:$0xff] %vm376_vm0, %v716_v41  ;;  %v465_v42 = vld [vmem:[%s3785_s29 + $0x159] sm:$0xff]  ;;  %v464_v43 = vld [vmem:[%s3785_s29 + $0x151] sm:$0xff] }
  0x40   : > { %v355_v45 = vld [vmem:[%s3785_s29 + $0xc0] sm:$0xff]  ;;  %402 = vst.msk [vmem:[#allocation2 + $0x190] sm:$0xff] %vm376_vm0, %v356_v44  ;;  %v718_v48 = vld [vmem:[%s3785_s29 + $0xca] sm:$0xff]  ;;  %v358_v49 = vld [vmem:[%s3785_s29 + $0xd8] sm:$0xff] }
  0x41   : > { %401 = vst.msk [vmem:[#allocation2 + $0x180] sm:$0xff] %vm376_vm0, %v355_v45  ;;  %v466_v46 = vld [vmem:[%s3785_s29 + $0x161] sm:$0xff]  ;;  %763 = vst.msk [vmem:[#allocation2 + $0x198] sm:$0xff] %vm376_vm0, %v718_v48  ;;  %v357_v50 = vld [vmem:[%s3785_s29 + $0xd0] sm:$0xff] }
  0x42   : > { %v717_v47 = vld [vmem:[%s3785_s29 + $0xc2] sm:$0xff]  ;;  %404 = vst.msk [vmem:[#allocation2 + $0x1b0] sm:$0xff] %vm376_vm0, %v358_v49  ;;  %403 = vst.msk [vmem:[#allocation2 + $0x1a0] sm:$0xff] %vm376_vm0, %v357_v50  ;;  %v719_v51 = vld [vmem:[%s3785_s29 + $0xd2] sm:$0xff] }
  0x43   : > { %554 = vrot.lane.b32.xlu1 %v443_v62, %s3670_s17  ;;  %552 = vrot.lane.b32.xlu0 %v442_v63, %s3670_s17  ;;  %762 = vst.msk [vmem:[#allocation2 + $0x188] sm:$0xff] %vm376_vm0, %v717_v47  ;;  %v720_v52 = vld [vmem:[%s3785_s29 + $0xda] sm:$0xff]  ;;  %764 = vst.msk [vmem:[#allocation2 + $0x1a8] sm:$0xff] %vm376_vm0, %v719_v51  ;;  %v360_v53 = vld [vmem:[%s3785_s29 + $0xe8] sm:$0xff] }
  0x44   : > { %765 = vst.msk [vmem:[#allocation2 + $0x1b8] sm:$0xff] %vm376_vm0, %v720_v52  ;;  %v359_v54 = vld [vmem:[%s3785_s29 + $0xe0] sm:$0xff]  ;;  %406 = vst.msk [vmem:[#allocation2 + $0x1d0] sm:$0xff] %vm376_vm0, %v360_v53  ;;  %v722_v56 = vld [vmem:[%s3785_s29 + $0xea] sm:$0xff] }
  0x45   : > { %405 = vst.msk [vmem:[#allocation2 + $0x1c0] sm:$0xff] %vm376_vm0, %v359_v54  ;;  %v721_v55 = vld [vmem:[%s3785_s29 + $0xe2] sm:$0xff]  ;;  %767 = vst.msk [vmem:[#allocation2 + $0x1d8] sm:$0xff] %vm376_vm0, %v722_v56  ;;  %v362_v57 = vld [vmem:[%s3785_s29 + $0xf8] sm:$0xff] }
  0x46   : > { %766 = vst.msk [vmem:[#allocation2 + $0x1c8] sm:$0xff] %vm376_vm0, %v721_v55  ;;  %v361_v58 = vld [vmem:[%s3785_s29 + $0xf0] sm:$0xff]  ;;  %408 = vst.msk [vmem:[#allocation2 + $0x1f0] sm:$0xff] %vm376_vm0, %v362_v57  ;;  %v724_v60 = vld [vmem:[%s3785_s29 + $0xfa] sm:$0xff] }
  0x47   : > { %558 = vrot.lane.b32.xlu1 %v445_v1, %s3670_s17  ;;  %556 = vrot.lane.b32.xlu0 %v444_v3, %s3670_s17  ;;  %407 = vst.msk [vmem:[#allocation2 + $0x1e0] sm:$0xff] %vm376_vm0, %v361_v58  ;;  %v723_v59 = vld [vmem:[%s3785_s29 + $0xf2] sm:$0xff]  ;;  %769 = vst.msk [vmem:[#allocation2 + $0x1f8] sm:$0xff] %vm376_vm0, %v724_v60  ;;  %v364_v61 = vld [vmem:[%s3785_s29 + $0x108] sm:$0xff] }
  0x48   : > { %768 = vst.msk [vmem:[#allocation2 + $0x1e8] sm:$0xff] %vm376_vm0, %v723_v59  ;;  %v363_v62 = vld [vmem:[%s3785_s29 + $0x100] sm:$0xff]  ;;  %410 = vst.msk [vmem:[#allocation2 + $0x210] sm:$0xff] %vm376_vm0, %v364_v61  ;;  %v726_v4 = vld [vmem:[%s3785_s29 + $0x10a] sm:$0xff] }
  0x49   : > { %409 = vst.msk [vmem:[#allocation2 + $0x200] sm:$0xff] %vm376_vm0, %v363_v62  ;;  %v725_v2 = vld [vmem:[%s3785_s29 + $0x102] sm:$0xff]  ;;  %771 = vst.msk [vmem:[#allocation2 + $0x218] sm:$0xff] %vm376_vm0, %v726_v4  ;;  %v366_v5 = vld [vmem:[%s3785_s29 + $0x118] sm:$0xff] }
  0x4a   : > { %770 = vst.msk [vmem:[#allocation2 + $0x208] sm:$0xff] %vm376_vm0, %v725_v2  ;;  %v788_v9 = vld [vmem:[#allocation2 + $0x28] sm:$0xff]  ;;  %412 = vst.msk [vmem:[#allocation2 + $0x230] sm:$0xff] %vm376_vm0, %v366_v5  ;;  %v728_v12 = vld [vmem:[%s3785_s29 + $0x11a] sm:$0xff] }
  0x4b   : > { %562 = vrot.lane.b32.xlu1 %v447_v6, %s3670_s17  ;;  %560 = vrot.lane.b32.xlu0 %v446_v7, %s3670_s17  ;;  %v365_v6 = vld [vmem:[%s3785_s29 + $0x110] sm:$0xff]  ;;  %773 = vst.msk [vmem:[#allocation2 + $0x238] sm:$0xff] %vm376_vm0, %v728_v12  ;;  %v794_v20 = vld [vmem:[#allocation2 + $0x58] sm:$0xff]  ;;  %v368_v21 = vld [vmem:[%s3785_s29 + $0x128] sm:$0xff] }
  0x4c   : > { %411 = vst.msk [vmem:[#allocation2 + $0x220] sm:$0xff] %vm376_vm0, %v365_v6  ;;  %414 = vst.msk [vmem:[#allocation2 + $0x250] sm:$0xff] %vm376_vm0, %v368_v21  ;;  %v796_v33 = vld [vmem:[#allocation2 + $0x68] sm:$0xff]  ;;  %v369_v36 = vld [vmem:[%s3785_s29 + $0x130] sm:$0xff] }
  0x4d   : > { %415 = vst.msk [vmem:[#allocation2 + $0x260] sm:$0xff] %vm376_vm0, %v369_v36  ;;  %v372_v47 = vld [vmem:[%s3785_s29 + $0x148] sm:$0xff]  ;;  %v371_v48 = vld [vmem:[%s3785_s29 + $0x140] sm:$0xff]  ;;  %v802_v54 = vld [vmem:[#allocation2 + $0x98] sm:$0xff] }
  0x4e   : > { %418 = vst.msk [vmem:[#allocation2 + $0x290] sm:$0xff] %vm376_vm0, %v372_v47  ;;  %417 = vst.msk [vmem:[#allocation2 + $0x280] sm:$0xff] %vm376_vm0, %v371_v48  ;;  %v800_v53 = vld [vmem:[#allocation2 + $0x88] sm:$0xff]  ;;  %v374_v61 = vld [vmem:[%s3785_s29 + $0x158] sm:$0xff] }
  0x4f   : > { %566 = vrot.lane.b32.xlu1 %v449_v10, %s3670_s17  ;;  %564 = vrot.lane.b32.xlu0 %v448_v11, %s3670_s17  ;;  %v790_v10 = vld [vmem:[#allocation2 + $0x38] sm:$0xff]  ;;  %v733_v56 = vld [vmem:[%s3785_s29 + $0x142] sm:$0xff]  ;;  %v882_v57 = vpack.c.bf16 %v802_v54, %v800_v53  ;;  %v734_v60 = vld [vmem:[%s3785_s29 + $0x14a] sm:$0xff]  ;;  %420 = vst.msk [vmem:[#allocation2 + $0x2b0] sm:$0xff] %vm376_vm0, %v374_v61 }
  0x50   : > { %v727_v11 = vld [vmem:[%s3785_s29 + $0x112] sm:$0xff]  ;;  %778 = vst.msk [vmem:[#allocation2 + $0x288] sm:$0xff] %vm376_vm0, %v733_v56  ;;  %779 = vst.msk [vmem:[#allocation2 + $0x298] sm:$0xff] %vm376_vm0, %v734_v60  ;;  %v820_v47 = vld [vmem:[#allocation2 + $0x128] sm:$0xff] }
  0x51   : > { %772 = vst.msk [vmem:[#allocation2 + $0x228] sm:$0xff] %vm376_vm0, %v727_v11  ;;  %v373_v62 = vld [vmem:[%s3785_s29 + $0x150] sm:$0xff]  ;;  %v806_v4 = vld [vmem:[#allocation2 + $0xb8] sm:$0xff]  ;;  %v375_v11 = vld [vmem:[%s3785_s29 + $0x160] sm:$0xff] }
  0x52   : > { %419 = vst.msk [vmem:[#allocation2 + $0x2a0] sm:$0xff] %vm376_vm0, %v373_v62  ;;  %v735_v6 = vld [vmem:[%s3785_s29 + $0x152] sm:$0xff]  ;;  %421 = vst.msk [vmem:[#allocation2 + $0x2c0] sm:$0xff] %vm376_vm0, %v375_v11 }
  0x53   : > { %570 = vrot.lane.b32.xlu1 %v451_v14, %s3670_s17  ;;  %568 = vrot.lane.b32.xlu0 %v450_v15, %s3670_s17  ;;  %v876_v15 = vpack.c.bf16 %v790_v10, %v788_v9  ;;  %780 = vst.msk [vmem:[#allocation2 + $0x2a8] sm:$0xff] %vm376_vm0, %v735_v6  ;;  %v822_v48 = vld [vmem:[#allocation2 + $0x138] sm:$0xff] }
  0x57   : > { %574 = vrot.lane.b32.xlu1 %v453_v18, %s3670_s17  ;;  %572 = vrot.lane.b32.xlu0 %v452_v19, %s3670_s17  ;;  %v792_v19 = vld [vmem:[#allocation2 + $0x48] sm:$0xff] }
  0x58   : > { %v878_v28 = vpack.c.bf16 %v794_v20, %v792_v19  ;;  %v737_v19 = vld [vmem:[%s3785_s29 + $0x162] sm:$0xff] }
  0x59   : > { %782 = vst.msk [vmem:[#allocation2 + $0x2c8] sm:$0xff] %vm376_vm0, %v737_v19 }
  0x5b   : > { %578 = vrot.lane.b32.xlu1 %v455_v22, %s3670_s17  ;;  %576 = vrot.lane.b32.xlu0 %v454_v23, %s3670_s17  ;;  %v367_v22 = vld [vmem:[%s3785_s29 + $0x120] sm:$0xff] }
  0x5c   : > { %413 = vst.msk [vmem:[#allocation2 + $0x240] sm:$0xff] %vm376_vm0, %v367_v22 }
  0x5f   : > { %582 = vrot.lane.b32.xlu1 %v457_v26, %s3670_s17  ;;  %580 = vrot.lane.b32.xlu0 %v456_v27, %s3670_s17  ;;  %v729_v27 = vld [vmem:[%s3785_s29 + $0x122] sm:$0xff] }
  0x60   : > { %774 = vst.msk [vmem:[#allocation2 + $0x248] sm:$0xff] %vm376_vm0, %v729_v27  ;;  %v812_v27 = vld [vmem:[#allocation2 + $0xe8] sm:$0xff] }
  0x63   : > { %586 = vrot.lane.b32.xlu1 %v459_v30, %s3670_s17  ;;  %584 = vrot.lane.b32.xlu0 %v458_v31, %s3670_s17  ;;  %v730_v31 = vld [vmem:[%s3785_s29 + $0x12a] sm:$0xff] }
  0x64   : > { %775 = vst.msk [vmem:[#allocation2 + $0x258] sm:$0xff] %vm376_vm0, %v730_v31 }
  0x67   : > { %590 = vrot.lane.b32.xlu1 %v461_v34, %s3670_s17  ;;  %588 = vrot.lane.b32.xlu0 %v460_v35, %s3670_s17  ;;  %v798_v34 = vld [vmem:[#allocation2 + $0x78] sm:$0xff] }
  0x68   : > { %v370_v35 = vld [vmem:[%s3785_s29 + $0x138] sm:$0xff]  ;;  %v880_v44 = vpack.c.bf16 %v798_v34, %v796_v33 }
  0x69   : > { %416 = vst.msk [vmem:[#allocation2 + $0x270] sm:$0xff] %vm376_vm0, %v370_v35 }
  0x6b   : > { %594 = vrot.lane.b32.xlu1 %v463_v38, %s3670_s17  ;;  %592 = vrot.lane.b32.xlu0 %v462_v39, %s3670_s17 }
  0x6f   : > { %598 = vrot.lane.b32.xlu1 %v465_v42, %s3670_s17  ;;  %596 = vrot.lane.b32.xlu0 %v464_v43, %s3670_s17  ;;  %v731_v42 = vld [vmem:[%s3785_s29 + $0x132] sm:$0xff]  ;;  %v732_v43 = vld [vmem:[%s3785_s29 + $0x13a] sm:$0xff] }
  0x70   : > { %776 = vst.msk [vmem:[#allocation2 + $0x268] sm:$0xff] %vm376_vm0, %v731_v42  ;;  %777 = vst.msk [vmem:[#allocation2 + $0x278] sm:$0xff] %vm376_vm0, %v732_v43 }
  0x73   : > { %600 = vrot.lane.b32.xlu0 %v466_v46, %s3670_s17  ;;  %s3609_s17 = sshll.u32 %s3673_s13, 4  ;;  %s3610_s17 = int_to_ptr.vmem [resolvable:$false] %s3609_s17 }
  0x74   : > { %s3611_s14 = scalar_lea.vmem %s3610_s17, 32  ;;  %p3612_p0 = scmp.lt.s32.totalorder %s4662_s24, %s3610_s17 }
  0x8d   : > { %v513_v63 = vpop.permute.xlu0 %512  ;;  %v517_v0 = vpop.permute.xlu1 %516 }
  0x8e   : > { %648 = vst.msk [vmem:[#allocation2] sm:$0xff] %vm647_vm1, %v513_v63  ;;  %650 = vst.msk [vmem:[#allocation2 + $0x20] sm:$0xff] %vm647_vm1, %v517_v0 }
  0x91   : > { %v515_v1 = vpop.permute.xlu0 %514  ;;  %v519_v3 = vpop.permute.xlu1 %518 }
  0x92   : > { %649 = vst.msk [vmem:[#allocation2 + $0x10] sm:$0xff] %vm647_vm1, %v515_v1  ;;  %651 = vst.msk [vmem:[#allocation2 + $0x30] sm:$0xff] %vm647_vm1, %v519_v3  ;;  %v804_v3 = vld [vmem:[#allocation2 + $0xa8] sm:$0xff] }
  0x95   : > { %v523_v7 = vpop.permute.xlu1 %522  ;;  %v521_v8 = vpop.permute.xlu0 %520  ;;  %v783_v13 = vld [vmem:[#allocation2] sm:$0xff] }
  0x96   : > { %653 = vst.msk [vmem:[#allocation2 + $0x50] sm:$0xff] %vm647_vm1, %v523_v7  ;;  %652 = vst.msk [vmem:[#allocation2 + $0x40] sm:$0xff] %vm647_vm1, %v521_v8  ;;  %v787_v23 = vld [vmem:[#allocation2 + $0x20] sm:$0xff]  ;;  %v884_v8 = vpack.c.bf16 %v806_v4, %v804_v3  ;;  %v830_v3 = vld [vmem:[#allocation2 + $0x178] sm:$0xff] }
  0x97   : > { %v736_v7 = vld [vmem:[%s3785_s29 + $0x15a] sm:$0xff]  ;;  %s3605_s29 = scalar_lea.vmem %s4662_s24, 16 }
  0x98   : > { %781 = vst.msk [vmem:[#allocation2 + $0x2b8] sm:$0xff] %vm376_vm0, %v736_v7  ;;  %p3606_p11 = scmp.ne.s32.totalorder %s4662_s24, %s3605_s29  ;;  %p3613_p1 = scmp.lt.s32.totalorder %s3611_s14, %s3605_s29 }
  0x99   : > { %v785_v14 = vld [vmem:[#allocation2 + $0x10] sm:$0xff]  ;;  %v527_v16 = vpop.permute.xlu1 %526  ;;  %v525_v17 = vpop.permute.xlu0 %524 }
  0x9a   : > { %v873_v18 = vpack.c.bf16 %v785_v14, %v783_v13  ;;  %655 = vst.msk [vmem:[#allocation2 + $0x70] sm:$0xff] %vm647_vm1, %v527_v16  ;;  %654 = vst.msk [vmem:[#allocation2 + $0x60] sm:$0xff] %vm647_vm1, %v525_v17  ;;  %v789_v24 = vld [vmem:[#allocation2 + $0x30] sm:$0xff]  ;;  %v808_v16 = vld [vmem:[#allocation2 + $0xc8] sm:$0xff]  ;;  %p3607_p12 = pnand %p3606_p11, %p3762_p5  ;;  %p3614_p2 = por %p3613_p1, %p3612_p0 }
  0x9b   : > { %v875_v32 = vpack.c.bf16 %v789_v24, %v787_v23  ;;  %v810_v17 = vld [vmem:[#allocation2 + $0xd8] sm:$0xff] }
  0x9c   : > { %1124 = vmatmul.mubr.bf16.vlgmr.msra.gmra.mrb[0].mxu0 %v873_v18  ;;  %v886_v20 = vpack.c.bf16 %v810_v17, %v808_v16  ;;  %p3608_p13 = pneg %p3607_p12 }
  0x9d   : > { %3098 = vmatprep.mubr.msk.bf16.mxu0 %vm376_vm0, %v876_v15  ;;  %v531_v25 = vpop.permute.xlu1 %530  ;;  %v529_v26 = vpop.permute.xlu0 %528  ;;  %v791_v37 = vld [vmem:[#allocation2 + $0x40] sm:$0xff]  ;;  %v793_v38 = vld [vmem:[#allocation2 + $0x50] sm:$0xff] }
  0x9e   : > { %657 = vst.msk [vmem:[#allocation2 + $0x90] sm:$0xff] %vm647_vm1, %v531_v25  ;;  %656 = vst.msk [vmem:[#allocation2 + $0x80] sm:$0xff] %vm647_vm1, %v529_v26  ;;  %v877_v41 = vpack.c.bf16 %v793_v38, %v791_v37  ;;  %v816_v37 = vld [vmem:[#allocation2 + $0x108] sm:$0xff]  ;;  %v818_v38 = vld [vmem:[#allocation2 + $0x118] sm:$0xff]  ;;  %p3615_p3 = pnand %p3614_p2, %p3608_p13 }
  0xa1   : > { %v535_v29 = vpop.permute.xlu1 %534  ;;  %v533_v30 = vpop.permute.xlu0 %532  ;;  %v795_v49 = vld [vmem:[#allocation2 + $0x60] sm:$0xff]  ;;  %v797_v50 = vld [vmem:[#allocation2 + $0x70] sm:$0xff] }
  0xa2   : > { %659 = vst.msk [vmem:[#allocation2 + $0xb0] sm:$0xff] %vm647_vm1, %v535_v29  ;;  %658 = vst.msk [vmem:[#allocation2 + $0xa0] sm:$0xff] %vm647_vm1, %v533_v30  ;;  %v879_v55 = vpack.c.bf16 %v797_v50, %v795_v49  ;;  %v892_v50 = vpack.c.bf16 %v822_v48, %v820_v47 }
  0xa4   : > { %1132 = vmatmul.mubr.bf16.gmra.mrb[4].mxu0 %v875_v32 }
  0xa5   : > { %3099 = vmatprep.mubr.msk.bf16.mxu0 %vm376_vm0, %v878_v28  ;;  %v539_v39 = vpop.permute.xlu1 %538  ;;  %v537_v40 = vpop.permute.xlu0 %536  ;;  %v799_v63 = vld [vmem:[#allocation2 + $0x80] sm:$0xff]  ;;  %v801_v0 = vld [vmem:[#allocation2 + $0x90] sm:$0xff]  ;;  %v814_v28 = vld [vmem:[#allocation2 + $0xf8] sm:$0xff] }
  0xa6   : > { %661 = vst.msk [vmem:[#allocation2 + $0xd0] sm:$0xff] %vm647_vm1, %v539_v39  ;;  %660 = vst.msk [vmem:[#allocation2 + $0xc0] sm:$0xff] %vm647_vm1, %v537_v40  ;;  %v881_v5 = vpack.c.bf16 %v801_v0, %v799_v63  ;;  %v888_v30 = vpack.c.bf16 %v814_v28, %v812_v27  ;;  %v890_v40 = vpack.c.bf16 %v818_v38, %v816_v37  ;;  %v846_v27 = vld [vmem:[#allocation2 + $0x1f8] sm:$0xff]  ;;  %v852_v38 = vld [vmem:[#allocation2 + $0x228] sm:$0xff] }
  0xa9   : > { %v543_v45 = vpop.permute.xlu1 %542  ;;  %v541_v46 = vpop.permute.xlu0 %540  ;;  %v803_v12 = vld [vmem:[#allocation2 + $0xa0] sm:$0xff]  ;;  %v805_v13 = vld [vmem:[#allocation2 + $0xb0] sm:$0xff] }
  0xaa   : > { %663 = vst.msk [vmem:[#allocation2 + $0xf0] sm:$0xff] %vm647_vm1, %v543_v45  ;;  %662 = vst.msk [vmem:[#allocation2 + $0xe0] sm:$0xff] %vm647_vm1, %v541_v46  ;;  %v883_v18 = vpack.c.bf16 %v805_v13, %v803_v12 }
  0xac   : > { %1140 = vmatmul.mubr.bf16.gmra.mrb[8].mxu0 %v877_v41 }
  0xad   : > { %3100 = vmatprep.mubr.msk.bf16.mxu0 %vm376_vm0, %v880_v44  ;;  %v547_v51 = vpop.permute.xlu1 %546  ;;  %v545_v52 = vpop.permute.xlu0 %544  ;;  %v807_v23 = vld [vmem:[#allocation2 + $0xc0] sm:$0xff]  ;;  %v809_v24 = vld [vmem:[#allocation2 + $0xd0] sm:$0xff] }
  0xae   : > { %665 = vst.msk [vmem:[#allocation2 + $0x110] sm:$0xff] %vm647_vm1, %v547_v51  ;;  %664 = vst.msk [vmem:[#allocation2 + $0x100] sm:$0xff] %vm647_vm1, %v545_v52  ;;  %v885_v29 = vpack.c.bf16 %v809_v24, %v807_v23 }
  0xb1   : > { %v551_v58 = vpop.permute.xlu1 %550  ;;  %v549_v59 = vpop.permute.xlu0 %548  ;;  %v811_v33 = vld [vmem:[#allocation2 + $0xe0] sm:$0xff]  ;;  %v813_v34 = vld [vmem:[#allocation2 + $0xf0] sm:$0xff] }
  0xb2   : > { %667 = vst.msk [vmem:[#allocation2 + $0x130] sm:$0xff] %vm647_vm1, %v551_v58  ;;  %666 = vst.msk [vmem:[#allocation2 + $0x120] sm:$0xff] %vm647_vm1, %v549_v59  ;;  %v887_v39 = vpack.c.bf16 %v813_v34, %v811_v33  ;;  %v826_v58 = vld [vmem:[#allocation2 + $0x158] sm:$0xff] }
  0xb3   : > { %v850_v33 = vld [vmem:[#allocation2 + $0x218] sm:$0xff] }
  0xb4   : > { %1148 = vmatmul.mubr.bf16.gmra.mrb[12].mxu0 %v879_v55 }
  0xb5   : > { %3101 = vmatprep.mubr.msk.bf16.mxu0 %vm376_vm0, %v882_v57  ;;  %v555_v2 = vpop.permute.xlu1 %554  ;;  %v553_v1 = vpop.permute.xlu0 %552  ;;  %v815_v43 = vld [vmem:[#allocation2 + $0x100] sm:$0xff]  ;;  %v817_v44 = vld [vmem:[#allocation2 + $0x110] sm:$0xff]  ;;  %v824_v57 = vld [vmem:[#allocation2 + $0x148] sm:$0xff] }
  0xb6   : > { %669 = vst.msk [vmem:[#allocation2 + $0x150] sm:$0xff] %vm647_vm1, %v555_v2  ;;  %668 = vst.msk [vmem:[#allocation2 + $0x140] sm:$0xff] %vm647_vm1, %v553_v1  ;;  %v889_v49 = vpack.c.bf16 %v817_v44, %v815_v43  ;;  %v894_v60 = vpack.c.bf16 %v826_v58, %v824_v57  ;;  %v828_v1 = vld [vmem:[#allocation2 + $0x168] sm:$0xff]  ;;  %v866_v57 = vld [vmem:[#allocation2 + $0x298] sm:$0xff] }
  0xb7   : > { %v856_v44 = vld [vmem:[#allocation2 + $0x248] sm:$0xff] }
  0xb9   : > { %v559_v9 = vpop.permute.xlu1 %558  ;;  %v557_v10 = vpop.permute.xlu0 %556  ;;  %v819_v53 = vld [vmem:[#allocation2 + $0x120] sm:$0xff]  ;;  %v821_v54 = vld [vmem:[#allocation2 + $0x130] sm:$0xff] }
  0xba   : > { %671 = vst.msk [vmem:[#allocation2 + $0x170] sm:$0xff] %vm647_vm1, %v559_v9  ;;  %670 = vst.msk [vmem:[#allocation2 + $0x160] sm:$0xff] %vm647_vm1, %v557_v10  ;;  %v891_v59 = vpack.c.bf16 %v821_v54, %v819_v53  ;;  %v834_v9 = vld [vmem:[#allocation2 + $0x198] sm:$0xff] }
  0xbc   : > { %1156 = vmatmul.mubr.bf16.gmra.mrb[16].mxu0 %v881_v5  ;;  %v896_v5 = vpack.c.bf16 %v830_v3, %v828_v1  ;;  %v3671_v1 = vmov 0.0  }
  0xbd   : > { %3102 = vmatprep.mubr.msk.bf16.mxu0 %vm376_vm0, %v884_v8  ;;  %v563_v14 = vpop.permute.xlu1 %562  ;;  %v561_v15 = vpop.permute.xlu0 %560  ;;  %v823_v63 = vld [vmem:[#allocation2 + $0x140] sm:$0xff]  ;;  %v825_v0 = vld [vmem:[#allocation2 + $0x150] sm:$0xff]  ;;  %v832_v8 = vld [vmem:[#allocation2 + $0x188] sm:$0xff]  ;;  %1536 = vst [vmem:[#allocation4] sm:$0xff] %v3671_v1  ;;  %3413 = vmatprep.subr.bf16.mxu0 %v3671_v1 }
  0xbe   : > { %673 = vst.msk [vmem:[#allocation2 + $0x190] sm:$0xff] %vm647_vm1, %v563_v14  ;;  %672 = vst.msk [vmem:[#allocation2 + $0x180] sm:$0xff] %vm647_vm1, %v561_v15  ;;  %v893_v4 = vpack.c.bf16 %v825_v0, %v823_v63  ;;  %v898_v11 = vpack.c.bf16 %v834_v9, %v832_v8  ;;  %v836_v14 = vld [vmem:[#allocation2 + $0x1a8] sm:$0xff]  ;;  %v838_v15 = vld [vmem:[#allocation2 + $0x1b8] sm:$0xff] }
  0xbf   : > { %v900_v17 = vpack.c.bf16 %v838_v15, %v836_v14  ;;  %v870_v63 = vld [vmem:[#allocation2 + $0x2b8] sm:$0xff]  ;;  %1537 = vst [vmem:[#allocation4 + $0x8] sm:$0xff] %v3671_v1  ;;  %1538 = vst [vmem:[#allocation4 + $0x10] sm:$0xff] %v3671_v1  ;;  %v3493_v14 = vld [vmem:[%s4706_s3 + $0x50] sm:$0xff]  }
  0xc0   : > { %1539 = vst [vmem:[#allocation4 + $0x18] sm:$0xff] %v3671_v1  ;;  %v3494_v15 = vld [vmem:[%s4706_s3 + $0x10] sm:$0xff]  }
  0xc1   : > { %v567_v21 = vpop.permute.xlu1 %566  ;;  %v565_v22 = vpop.permute.xlu0 %564  ;;  %v827_v6 = vld [vmem:[#allocation2 + $0x160] sm:$0xff]  ;;  %v829_v7 = vld [vmem:[#allocation2 + $0x170] sm:$0xff] }
  0xc2   : > { %675 = vst.msk [vmem:[#allocation2 + $0x1b0] sm:$0xff] %vm647_vm1, %v567_v21  ;;  %674 = vst.msk [vmem:[#allocation2 + $0x1a0] sm:$0xff] %vm647_vm1, %v565_v22  ;;  %v895_v10 = vpack.c.bf16 %v829_v7, %v827_v6  ;;  %v842_v21 = vld [vmem:[#allocation2 + $0x1d8] sm:$0xff] }
  0xc4   : > { %1164 = vmatmul.mubr.bf16.gmra.mrb[20].mxu0 %v883_v18 }
  0xc5   : > { %3103 = vmatprep.mubr.msk.bf16.mxu0 %vm376_vm0, %v886_v20  ;;  %v571_v25 = vpop.permute.xlu1 %570  ;;  %v569_v26 = vpop.permute.xlu0 %568  ;;  %v831_v12 = vld [vmem:[#allocation2 + $0x180] sm:$0xff]  ;;  %v833_v13 = vld [vmem:[#allocation2 + $0x190] sm:$0xff]  ;;  %v840_v20 = vld [vmem:[#allocation2 + $0x1c8] sm:$0xff] }
  0xc6   : > { %677 = vst.msk [vmem:[#allocation2 + $0x1d0] sm:$0xff] %vm647_vm1, %v571_v25  ;;  %676 = vst.msk [vmem:[#allocation2 + $0x1c0] sm:$0xff] %vm647_vm1, %v569_v26  ;;  %v897_v16 = vpack.c.bf16 %v833_v13, %v831_v12  ;;  %v902_v23 = vpack.c.bf16 %v842_v21, %v840_v20  ;;  %v844_v26 = vld [vmem:[#allocation2 + $0x1e8] sm:$0xff] }
  0xc7   : > { %v3491_v12 = vld [vmem:[%s4706_s3 + $0x48] sm:$0xff]  }
  0xc8   : > { %v3492_v13 = vld [vmem:[%s4706_s3 + $0x8] sm:$0xff]  }
  0xc9   : > { %v575_v31 = vpop.permute.xlu1 %574  ;;  %v573_v32 = vpop.permute.xlu0 %572  ;;  %v835_v18 = vld [vmem:[#allocation2 + $0x1a0] sm:$0xff]  ;;  %v837_v19 = vld [vmem:[#allocation2 + $0x1b0] sm:$0xff]  ;;  %v3499_v20 = vld [vmem:[%s4706_s3 + $0x68] sm:$0xff]  }
  0xca   : > { %679 = vst.msk [vmem:[#allocation2 + $0x1f0] sm:$0xff] %vm647_vm1, %v575_v31  ;;  %678 = vst.msk [vmem:[#allocation2 + $0x1e0] sm:$0xff] %vm647_vm1, %v573_v32  ;;  %v899_v22 = vpack.c.bf16 %v837_v19, %v835_v18  ;;  %v848_v32 = vld [vmem:[#allocation2 + $0x208] sm:$0xff]  ;;  %v3497_v18 = vld [vmem:[%s4706_s3 + $0x60] sm:$0xff]  }
  0xcb   : > { %v3498_v19 = vld [vmem:[%s4706_s3 + $0x20] sm:$0xff]   ;;  %v3500_v21 = vld [vmem:[%s4706_s3 + $0x28] sm:$0xff]  }
  0xcc   : > { %1172 = vmatmul.mubr.bf16.gmra.mrb[24].mxu0 %v885_v29  ;;  %v904_v29 = vpack.c.bf16 %v846_v27, %v844_v26 }
  0xcd   : > { %3104 = vmatprep.mubr.msk.bf16.mxu0 %vm376_vm0, %v888_v30  ;;  %v579_v35 = vpop.permute.xlu1 %578  ;;  %v577_v36 = vpop.permute.xlu0 %576  ;;  %v839_v24 = vld [vmem:[#allocation2 + $0x1c0] sm:$0xff]  ;;  %v841_v25 = vld [vmem:[#allocation2 + $0x1d0] sm:$0xff] }
  0xce   : > { %681 = vst.msk [vmem:[#allocation2 + $0x210] sm:$0xff] %vm647_vm1, %v579_v35  ;;  %680 = vst.msk [vmem:[#allocation2 + $0x200] sm:$0xff] %vm647_vm1, %v577_v36  ;;  %v901_v28 = vpack.c.bf16 %v841_v25, %v839_v24  ;;  %v906_v35 = vpack.c.bf16 %v850_v33, %v848_v32  ;;  %v3502_v24 = vld [vmem:[%s4706_s3 + $0x30] sm:$0xff]  }
  0xd1   : > { %v583_v41 = vpop.permute.xlu1 %582  ;;  %v581_v42 = vpop.permute.xlu0 %580  ;;  %v843_v30 = vld [vmem:[#allocation2 + $0x1e0] sm:$0xff]  ;;  %v845_v31 = vld [vmem:[#allocation2 + $0x1f0] sm:$0xff] }
  0xd2   : > { %683 = vst.msk [vmem:[#allocation2 + $0x230] sm:$0xff] %vm647_vm1, %v583_v41  ;;  %682 = vst.msk [vmem:[#allocation2 + $0x220] sm:$0xff] %vm647_vm1, %v581_v42  ;;  %v903_v34 = vpack.c.bf16 %v845_v31, %v843_v30  ;;  %v3504_v30 = vld [vmem:[%s4706_s3 + $0x38] sm:$0xff]  }
  0xd4   : > { %1180 = vmatmul.mubr.bf16.gmra.mrb[28].mxu0 %v887_v39  ;;  %v854_v39 = vld [vmem:[#allocation2 + $0x238] sm:$0xff] }
  0xd5   : > { %3105 = vmatprep.mubr.msk.bf16.mxu0 %vm376_vm0, %v890_v40  ;;  %v587_v45 = vpop.permute.xlu1 %586  ;;  %v585_v46 = vpop.permute.xlu0 %584  ;;  %v847_v36 = vld [vmem:[#allocation2 + $0x200] sm:$0xff]  ;;  %v849_v37 = vld [vmem:[#allocation2 + $0x210] sm:$0xff]  ;;  %v908_v41 = vpack.c.bf16 %v854_v39, %v852_v38 }
  0xd6   : > { %685 = vst.msk [vmem:[#allocation2 + $0x250] sm:$0xff] %vm647_vm1, %v587_v45  ;;  %684 = vst.msk [vmem:[#allocation2 + $0x240] sm:$0xff] %vm647_vm1, %v585_v46  ;;  %v905_v40 = vpack.c.bf16 %v849_v37, %v847_v36  ;;  %v858_v45 = vld [vmem:[#allocation2 + $0x258] sm:$0xff] }
  0xd7   : > { %v910_v47 = vpack.c.bf16 %v858_v45, %v856_v44 }
  0xd9   : > { %v591_v51 = vpop.permute.xlu1 %590  ;;  %v589_v52 = vpop.permute.xlu0 %588  ;;  %v851_v42 = vld [vmem:[#allocation2 + $0x220] sm:$0xff]  ;;  %v853_v43 = vld [vmem:[#allocation2 + $0x230] sm:$0xff] }
  0xda   : > { %687 = vst.msk [vmem:[#allocation2 + $0x270] sm:$0xff] %vm647_vm1, %v591_v51  ;;  %686 = vst.msk [vmem:[#allocation2 + $0x260] sm:$0xff] %vm647_vm1, %v589_v52  ;;  %v907_v46 = vpack.c.bf16 %v853_v43, %v851_v42  ;;  %v862_v51 = vld [vmem:[#allocation2 + $0x278] sm:$0xff] }
  0xdc   : > { %1188 = vmatmul.mubr.bf16.gmra.mrb[32].mxu0 %v889_v49 }
  0xdd   : > { %3106 = vmatprep.mubr.msk.bf16.mxu0 %vm376_vm0, %v892_v50  ;;  %v595_v55 = vpop.permute.xlu1 %594  ;;  %v593_v56 = vpop.permute.xlu0 %592  ;;  %v855_v48 = vld [vmem:[#allocation2 + $0x240] sm:$0xff]  ;;  %v857_v49 = vld [vmem:[#allocation2 + $0x250] sm:$0xff]  ;;  %v860_v50 = vld [vmem:[#allocation2 + $0x268] sm:$0xff] }
  0xde   : > { %689 = vst.msk [vmem:[#allocation2 + $0x290] sm:$0xff] %vm647_vm1, %v595_v55  ;;  %688 = vst.msk [vmem:[#allocation2 + $0x280] sm:$0xff] %vm647_vm1, %v593_v56  ;;  %v909_v52 = vpack.c.bf16 %v857_v49, %v855_v48  ;;  %v912_v53 = vpack.c.bf16 %v862_v51, %v860_v50  ;;  %v864_v56 = vld [vmem:[#allocation2 + $0x288] sm:$0xff] }
  0xe1   : > { %v599_v61 = vpop.permute.xlu1 %598  ;;  %v597_v62 = vpop.permute.xlu0 %596  ;;  %v859_v54 = vld [vmem:[#allocation2 + $0x260] sm:$0xff]  ;;  %v861_v55 = vld [vmem:[#allocation2 + $0x270] sm:$0xff] }
  0xe2   : > { %691 = vst.msk [vmem:[#allocation2 + $0x2b0] sm:$0xff] %vm647_vm1, %v599_v61  ;;  %690 = vst.msk [vmem:[#allocation2 + $0x2a0] sm:$0xff] %vm647_vm1, %v597_v62  ;;  %v911_v58 = vpack.c.bf16 %v861_v55, %v859_v54  ;;  %v868_v62 = vld [vmem:[#allocation2 + $0x2a8] sm:$0xff] }
  0xe4   : > { %1196 = vmatmul.mubr.bf16.gmra.mrb[36].mxu0 %v891_v59  ;;  %v914_v59 = vpack.c.bf16 %v866_v57, %v864_v56 }
  0xe5   : > { %3107 = vmatprep.mubr.msk.bf16.mxu0 %vm376_vm0, %v894_v60  ;;  %v601_v2 = vpop.permute.xlu0 %600  ;;  %v863_v60 = vld [vmem:[#allocation2 + $0x280] sm:$0xff]  ;;  %v865_v61 = vld [vmem:[#allocation2 + $0x290] sm:$0xff] }
  0xe6   : > { %692 = vst.msk [vmem:[#allocation2 + $0x2c0] sm:$0xff] %vm647_vm1, %v601_v2  ;;  %v913_v0 = vpack.c.bf16 %v865_v61, %v863_v60  ;;  %v916_v2 = vpack.c.bf16 %v870_v63, %v868_v62 }
  0xe9   : > { %v867_v3 = vld [vmem:[#allocation2 + $0x2a0] sm:$0xff] }
  0xec   : > { %1204 = vmatmul.mubr.bf16.gmra.mrb[40].mxu0 %v893_v4  ;;  %v869_v4 = vld [vmem:[#allocation2 + $0x2b0] sm:$0xff] }
  0xed   : > { %3108 = vmatprep.mubr.msk.bf16.mxu0 %vm376_vm0, %v896_v5  ;;  %v872_v5 = vld [vmem:[#allocation2 + $0x2c8] sm:$0xff]  ;;  %v915_v6 = vpack.c.bf16 %v869_v4, %v867_v3  ;;  %v871_v8 = vld [vmem:[#allocation2 + $0x2c0] sm:$0xff] }
  0xee   : > { %v918_v7 = vpack.c.bf16 %v872_v5, %v872_v5  ;;  %v917_v9 = vpack.c.bf16 %v871_v8, %v871_v8 }
  0xf4   : > { %1212 = vmatmul.mubr.bf16.gmra.mrb[44].mxu0 %v895_v10  ;;  %v3489_v10 = vld [vmem:[%s4706_s3 + $0x40] sm:$0xff]  }
  0xf5   : > { %3109 = vmatprep.mubr.msk.bf16.mxu0 %vm376_vm0, %v898_v11  ;;  %v3490_v11 = vld [vmem:[%s4706_s3] sm:$0xff]   ;;  %3236 = vmatprep.subr.bf16.mxu1 %v3489_v10 }
  0xf6   : > { %3237 = vmatpush3.bf16.msra.mxu1 %v3490_v11 }
  0xf7   : > { %3238 = vmatprep.subr.bf16.mxu1 %v3491_v12 }
  0xfa   : > { %3239 = vmatpush3.bf16.msra.mxu1 %v3492_v13 }
  0xfb   : > { %3240 = vmatprep.subr.bf16.mxu1 %v3493_v14 }
  0xfc   : > { %1220 = vmatmul.mubr.bf16.gmra.mrb[48].mxu0 %v897_v16  ;;  %v3495_v16 = vld [vmem:[%s4706_s3 + $0x58] sm:$0xff]  }
  0xfd   : > { %3110 = vmatprep.mubr.msk.bf16.mxu0 %vm376_vm0, %v900_v17  ;;  %v3496_v17 = vld [vmem:[%s4706_s3 + $0x18] sm:$0xff]  }
  0xfe   : > { %3241 = vmatpush3.bf16.msra.mxu1 %v3494_v15 }
  0xff   : > { %3242 = vmatprep.subr.bf16.mxu1 %v3495_v16 }
 0x102   : > { %3243 = vmatpush3.bf16.msra.mxu1 %v3496_v17 }
 0x103   : > { %3244 = vmatprep.subr.bf16.mxu1 %v3497_v18 }
 0x104   : > { %1228 = vmatmul.mubr.bf16.gmra.mrb[52].mxu0 %v899_v22  ;;  %v3501_v22 = vld [vmem:[%s4706_s3 + $0x70] sm:$0xff]  }
 0x105   : > { %3111 = vmatprep.mubr.msk.bf16.mxu0 %vm376_vm0, %v902_v23  ;;  %v4212_v23 = vld [vmem:[%s4705_s2] ss:$0 sm:$0xff] }
 0x106   : > { %3245 = vmatpush3.bf16.msra.mxu1 %v3498_v19 }
 0x107   : > { %3246 = vmatprep.subr.bf16.mxu1 %v3499_v20 }
 0x10a   : > { %3247 = vmatpush3.bf16.msra.mxu1 %v3500_v21 }
 0x10b   : > { %3248 = vmatprep.subr.bf16.mxu1 %v3501_v22 }
 0x10c   : > { %1236 = vmatmul.mubr.bf16.gmra.mrb[56].mxu0 %v901_v28  ;;  %v3503_v28 = vld [vmem:[%s4706_s3 + $0x78] sm:$0xff]  }
 0x10d   : > { %3112 = vmatprep.mubr.msk.bf16.mxu0 %vm376_vm0, %v904_v29 }
 0x10e   : > { %3249 = vmatpush3.bf16.msra.mxu1 %v3502_v24 }
 0x10f   : > { %3250 = vmatprep.subr.bf16.mxu1 %v3503_v28 }
 0x112   : > { %3251 = vmatpush3.bf16.msra.mxu1 %v3504_v30 }
 0x114   : > { %1244 = vmatmul.mubr.bf16.gmra.mrb[60].mxu0 %v903_v34 }
 0x115   : > { %3113 = vmatprep.mubr.msk.bf16.mxu0 %vm376_vm0, %v906_v35 }
 0x11c   : > { %1252 = vmatmul.mubr.bf16.gmra.mrb[64].mxu0 %v905_v40 }
 0x11d   : > { %3114 = vmatprep.mubr.msk.bf16.mxu0 %vm376_vm0, %v908_v41 }
 0x124   : > { %1260 = vmatmul.mubr.bf16.gmra.mrb[68].mxu0 %v907_v46 }
 0x125   : > { %3115 = vmatprep.mubr.msk.bf16.mxu0 %vm376_vm0, %v910_v47 }
 0x12c   : > { %1268 = vmatmul.mubr.bf16.gmra.mrb[72].mxu0 %v909_v52 }
 0x12d   : > { %3116 = vmatprep.mubr.msk.bf16.mxu0 %vm376_vm0, %v912_v53 }
 0x134   : > { %1276 = vmatmul.mubr.bf16.gmra.mrb[76].mxu0 %v911_v58 }
 0x135   : > { %3117 = vmatprep.mubr.msk.bf16.mxu0 %vm376_vm0, %v914_v59 }
 0x13c   : > { %1284 = vmatmul.mubr.bf16.gmra.mrb[80].mxu0 %v913_v0 }
 0x13d   : > { %3118 = vmatprep.mubr.msk.bf16.mxu0 %vm376_vm0, %v916_v2 }
 0x144   : > { %1292 = vmatmul.mubr.bf16.gmra.mrb[84].mxu0 %v915_v6 }
 0x145   : > { %3119 = vmatprep.mubr.msk.bf16.mxu0 %vm376_vm0, %v918_v7 }
 0x14c   : > { %1300 = vmatmul.mubr.bf16.gmra.mrb[88].mxu0 %v917_v9 }
 0x14d   : > { %3429 = vmatprep.mubr.msk.bf16.mxu0 %vm3672_vm4, %v3671_v1 }
 0x16f   : > { %v1125_v25 = vpop.f32.mrb[0].mxu0 }
 0x170   : > { %v1126_v26 = vadd.f32 %v4212_v23, %v1125_v25  ;;  %v1127_v27 = vpop.f32.mrb[1].mxu0 }
 0x171   : > { %v1128_v29 = vpop.f32.mrb[2].mxu0 }
 0x172   : > { %v1307_v31 = vmax.f32 %v1126_v26, 0.0  ;;  %v1129_v32 = vadd.f32 %v4212_v23, %v1128_v29  ;;  %v1130_v33 = vpop.f32.mrb[3].mxu0 }
 0x174   : > { %1352 = vst [vmem:[#allocation3] sm:$0xff] %v1307_v31  ;;  %v1308_v34 = vmax.f32 %v1129_v32, 0.0 }
 0x176   : > { %1353 = vst [vmem:[#allocation3 + $0x8] sm:$0xff] %v1308_v34 }
 0x177   : > { %v1133_v35 = vpop.f32.mrb[4].mxu0 }
 0x178   : > { %v1134_v36 = vadd.f32 %v4212_v23, %v1133_v35  ;;  %v1135_v37 = vpop.f32.mrb[5].mxu0 }
 0x179   : > { %v1136_v38 = vpop.f32.mrb[6].mxu0 }
 0x17a   : > { %v1309_v39 = vmax.f32 %v1134_v36, 0.0  ;;  %v1137_v40 = vadd.f32 %v4212_v23, %v1136_v38  ;;  %v1138_v41 = vpop.f32.mrb[7].mxu0 }
 0x17c   : > { %1354 = vst [vmem:[#allocation3 + $0x10] sm:$0xff] %v1309_v39  ;;  %v1310_v42 = vmax.f32 %v1137_v40, 0.0 }
 0x17e   : > { %1355 = vst [vmem:[#allocation3 + $0x18] sm:$0xff] %v1310_v42 }
 0x17f   : > { %v1141_v43 = vpop.f32.mrb[8].mxu0 }
 0x180   : > { %v1142_v44 = vadd.f32 %v4212_v23, %v1141_v43  ;;  %v1143_v45 = vpop.f32.mrb[9].mxu0 }
 0x181   : > { %v1144_v46 = vpop.f32.mrb[10].mxu0 }
 0x182   : > { %v1311_v47 = vmax.f32 %v1142_v44, 0.0  ;;  %v1145_v48 = vadd.f32 %v4212_v23, %v1144_v46  ;;  %v1146_v49 = vpop.f32.mrb[11].mxu0 }
 0x184   : > { %1356 = vst [vmem:[#allocation3 + $0x20] sm:$0xff] %v1311_v47  ;;  %v1312_v50 = vmax.f32 %v1145_v48, 0.0 }
 0x186   : > { %1357 = vst [vmem:[#allocation3 + $0x28] sm:$0xff] %v1312_v50 }
 0x187   : > { %v1149_v51 = vpop.f32.mrb[12].mxu0 }
 0x188   : > { %v1150_v52 = vadd.f32 %v4212_v23, %v1149_v51  ;;  %v1151_v53 = vpop.f32.mrb[13].mxu0 }
 0x189   : > { %v1152_v54 = vpop.f32.mrb[14].mxu0 }
 0x18a   : > { %v1313_v55 = vmax.f32 %v1150_v52, 0.0  ;;  %v1153_v56 = vadd.f32 %v4212_v23, %v1152_v54  ;;  %v1154_v57 = vpop.f32.mrb[15].mxu0 }
 0x18c   : > { %1358 = vst [vmem:[#allocation3 + $0x30] sm:$0xff] %v1313_v55  ;;  %v1314_v58 = vmax.f32 %v1153_v56, 0.0 }
 0x18e   : > { %1359 = vst [vmem:[#allocation3 + $0x38] sm:$0xff] %v1314_v58 }
 0x18f   : > { %v1157_v59 = vpop.f32.mrb[16].mxu0 }
 0x190   : > { %v1158_v60 = vadd.f32 %v4212_v23, %v1157_v59  ;;  %v1159_v61 = vpop.f32.mrb[17].mxu0 }
 0x191   : > { %v1160_v62 = vpop.f32.mrb[18].mxu0 }
 0x192   : > { %v1315_v63 = vmax.f32 %v1158_v60, 0.0  ;;  %v1161_v0 = vadd.f32 %v4212_v23, %v1160_v62  ;;  %v1162_v2 = vpop.f32.mrb[19].mxu0 }
 0x194   : > { %1360 = vst [vmem:[#allocation3 + $0x40] sm:$0xff] %v1315_v63  ;;  %v1316_v3 = vmax.f32 %v1161_v0, 0.0  ;;  %v4247_v63 = vld [vmem:[%s4706_s3 + $0x80] sm:$0xff]  }
 0x195   : > { %3393 = vmatprep.subr.bf16.mxu1 %v4247_v63 }
 0x196   : > { %1361 = vst [vmem:[#allocation3 + $0x48] sm:$0xff] %v1316_v3 }
 0x197   : > { %v1165_v4 = vpop.f32.mrb[20].mxu0 }
 0x198   : > { %v1166_v5 = vadd.f32 %v4212_v23, %v1165_v4  ;;  %v1167_v6 = vpop.f32.mrb[21].mxu0 }
 0x199   : > { %v1168_v7 = vpop.f32.mrb[22].mxu0 }
 0x19a   : > { %v1317_v8 = vmax.f32 %v1166_v5, 0.0  ;;  %v1169_v9 = vadd.f32 %v4212_v23, %v1168_v7  ;;  %v1170_v10 = vpop.f32.mrb[23].mxu0 }
 0x19c   : > { %1362 = vst [vmem:[#allocation3 + $0x50] sm:$0xff] %v1317_v8  ;;  %v1318_v11 = vmax.f32 %v1169_v9, 0.0 }
 0x19e   : > { %1363 = vst [vmem:[#allocation3 + $0x58] sm:$0xff] %v1318_v11 }
 0x19f   : > { %v1173_v12 = vpop.f32.mrb[24].mxu0 }
 0x1a0   : > { %v1174_v13 = vadd.f32 %v4212_v23, %v1173_v12  ;;  %v1175_v14 = vpop.f32.mrb[25].mxu0 }
 0x1a1   : > { %v1176_v15 = vpop.f32.mrb[26].mxu0 }
 0x1a2   : > { %v1319_v16 = vmax.f32 %v1174_v13, 0.0  ;;  %v1177_v17 = vadd.f32 %v4212_v23, %v1176_v15  ;;  %v1178_v18 = vpop.f32.mrb[27].mxu0 }
 0x1a3   : > { %v1397_v19 = vld [vmem:[#allocation3] ss:$12 sm:$0xff]  ;;  %v1405_v20 = vld [vmem:[#allocation3 + $0x1] ss:$12 sm:$0xff]  ;;  %v1417_v24 = vld [vmem:[#allocation3 + $0x2] ss:$12 sm:$0xff] }
 0x1a4   : > { %v1412_v21 = vmax.f32 %v1397_v19, %v1405_v20  ;;  %1364 = vst [vmem:[#allocation3 + $0x60] sm:$0xff] %v1319_v16  ;;  %v1320_v22 = vmax.f32 %v1177_v17, 0.0  ;;  %v1429_v26 = vld [vmem:[#allocation3 + $0x3] ss:$12 sm:$0xff] }
 0x1a5   : > { %v1441_v31 = vld [vmem:[#allocation3 + $0x4] ss:$12 sm:$0xff]  ;;  %v1453_v37 = vld [vmem:[#allocation3 + $0x5] ss:$12 sm:$0xff]  ;;  %v1465_v40 = vld [vmem:[#allocation3 + $0x6] ss:$12 sm:$0xff] }
 0x1a6   : > { %v1424_v25 = vmax.f32 %v1412_v21, %v1417_v24  ;;  %1365 = vst [vmem:[#allocation3 + $0x68] sm:$0xff] %v1320_v22  ;;  %v1477_v42 = vld [vmem:[#allocation3 + $0x7] ss:$12 sm:$0xff]  ;;  %v1489_v47 = vld [vmem:[#allocation3 + $0x8] ss:$12 sm:$0xff] }
 0x1a7   : > { %v1181_v27 = vpop.f32.mrb[28].mxu0  ;;  %v1501_v53 = vld [vmem:[#allocation3 + $0x9] ss:$12 sm:$0xff]  ;;  %v1513_v56 = vld [vmem:[#allocation3 + $0xa] ss:$12 sm:$0xff] }
 0x1a8   : > { %v1436_v28 = vmax.f32 %v1424_v25, %v1429_v26  ;;  %v1182_v29 = vadd.f32 %v4212_v23, %v1181_v27  ;;  %v1183_v30 = vpop.f32.mrb[29].mxu0  ;;  %v1525_v58 = vld [vmem:[#allocation3 + $0xb] ss:$12 sm:$0xff] }
 0x1a9   : > { %v1184_v32 = vpop.f32.mrb[30].mxu0 }
 0x1aa   : > { %v1448_v33 = vmax.f32 %v1436_v28, %v1441_v31  ;;  %v1321_v34 = vmax.f32 %v1182_v29, 0.0  ;;  %v1185_v35 = vadd.f32 %v4212_v23, %v1184_v32  ;;  %v1186_v36 = vpop.f32.mrb[31].mxu0 }
 0x1ac   : > { %v1460_v38 = vmax.f32 %v1448_v33, %v1453_v37  ;;  %1366 = vst [vmem:[#allocation3 + $0x70] sm:$0xff] %v1321_v34  ;;  %v1322_v39 = vmax.f32 %v1185_v35, 0.0 }
 0x1ae   : > { %v1472_v41 = vmax.f32 %v1460_v38, %v1465_v40  ;;  %1367 = vst [vmem:[#allocation3 + $0x78] sm:$0xff] %v1322_v39 }
 0x1af   : > { %v1189_v43 = vpop.f32.mrb[32].mxu0 }
 0x1b0   : > { %v1484_v44 = vmax.f32 %v1472_v41, %v1477_v42  ;;  %v1190_v45 = vadd.f32 %v4212_v23, %v1189_v43  ;;  %v1191_v46 = vpop.f32.mrb[33].mxu0 }
 0x1b1   : > { %v1192_v48 = vpop.f32.mrb[34].mxu0 }
 0x1b2   : > { %v1496_v49 = vmax.f32 %v1484_v44, %v1489_v47  ;;  %v1323_v50 = vmax.f32 %v1190_v45, 0.0  ;;  %v1193_v51 = vadd.f32 %v4212_v23, %v1192_v48  ;;  %v1194_v52 = vpop.f32.mrb[35].mxu0 }
 0x1b4   : > { %v1508_v54 = vmax.f32 %v1496_v49, %v1501_v53  ;;  %1368 = vst [vmem:[#allocation3 + $0x80] sm:$0xff] %v1323_v50  ;;  %v1324_v55 = vmax.f32 %v1193_v51, 0.0 }
 0x1b6   : > { %v1520_v57 = vmax.f32 %v1508_v54, %v1513_v56  ;;  %1369 = vst [vmem:[#allocation3 + $0x88] sm:$0xff] %v1324_v55 }
 0x1b7   : > { %v1197_v59 = vpop.f32.mrb[36].mxu0 }
 0x1b8   : > { %v4241_v60 = vmax.f32 %v1520_v57, %v1525_v58  ;;  %v1198_v61 = vadd.f32 %v4212_v23, %v1197_v59  ;;  %v1199_v62 = vpop.f32.mrb[37].mxu0 }
 0x1b9   : > { %v1200_v0 = vpop.f32.mrb[38].mxu0 }
 0x1ba   : > { %1540 = vst [vmem:[#allocation4 + $0x1] sm:$0xff] %v4241_v60  ;;  %v1325_v2 = vmax.f32 %v1198_v61, 0.0  ;;  %v1201_v3 = vadd.f32 %v4212_v23, %v1200_v0  ;;  %v1202_v4 = vpop.f32.mrb[39].mxu0 }
 0x1bc   : > { %1370 = vst [vmem:[#allocation3 + $0x90] sm:$0xff] %v1325_v2  ;;  %v1326_v5 = vmax.f32 %v1201_v3, 0.0 }
 0x1be   : > { %1371 = vst [vmem:[#allocation3 + $0x98] sm:$0xff] %v1326_v5 }
 0x1bf   : > { %v1205_v6 = vpop.f32.mrb[40].mxu0 }
 0x1c0   : > { %v1206_v7 = vadd.f32 %v4212_v23, %v1205_v6  ;;  %v1207_v8 = vpop.f32.mrb[41].mxu0 }
 0x1c1   : > { %v1208_v9 = vpop.f32.mrb[42].mxu0  ;;  %v4253_v10 = vld [vmem:[#allocation4] sm:$0xff] }
 0x1c2   : > { %v1327_v11 = vmax.f32 %v1206_v7, 0.0  ;;  %v1209_v12 = vadd.f32 %v4212_v23, %v1208_v9  ;;  %v1210_v13 = vpop.f32.mrb[43].mxu0 }
 0x1c4   : > { %1372 = vst [vmem:[#allocation3 + $0xa0] sm:$0xff] %v1327_v11  ;;  %v1328_v14 = vmax.f32 %v1209_v12, 0.0 }
 0x1c6   : > { %1373 = vst [vmem:[#allocation3 + $0xa8] sm:$0xff] %v1328_v14 }
 0x1c7   : > { %v1213_v15 = vpop.f32.mrb[44].mxu0 }
 0x1c8   : > { %v1214_v16 = vadd.f32 %v4212_v23, %v1213_v15  ;;  %v1215_v17 = vpop.f32.mrb[45].mxu0 }
 0x1c9   : > { %v1216_v18 = vpop.f32.mrb[46].mxu0 }
 0x1ca   : > { %v1329_v19 = vmax.f32 %v1214_v16, 0.0  ;;  %v1217_v20 = vadd.f32 %v4212_v23, %v1216_v18  ;;  %v1218_v21 = vpop.f32.mrb[47].mxu0 }
 0x1cc   : > { %1374 = vst [vmem:[#allocation3 + $0xb0] sm:$0xff] %v1329_v19  ;;  %v1330_v22 = vmax.f32 %v1217_v20, 0.0 }
 0x1ce   : > { %1375 = vst [vmem:[#allocation3 + $0xb8] sm:$0xff] %v1330_v22 }
 0x1cf   : > { %v1221_v24 = vpop.f32.mrb[48].mxu0 }
 0x1d0   : > { %v1222_v25 = vadd.f32 %v4212_v23, %v1221_v24  ;;  %v1223_v26 = vpop.f32.mrb[49].mxu0 }
 0x1d1   : > { %v1224_v27 = vpop.f32.mrb[50].mxu0 }
 0x1d2   : > { %v1331_v28 = vmax.f32 %v1222_v25, 0.0  ;;  %v1225_v29 = vadd.f32 %v4212_v23, %v1224_v27  ;;  %v1226_v30 = vpop.f32.mrb[51].mxu0 }
 0x1d3   : > { %v1399_v31 = vld [vmem:[#allocation3 + $0x60] ss:$12 sm:$0xff]  ;;  %v1407_v32 = vld [vmem:[#allocation3 + $0x61] ss:$12 sm:$0xff]  ;;  %v1419_v35 = vld [vmem:[#allocation3 + $0x62] ss:$12 sm:$0xff] }
 0x1d4   : > { %v1413_v33 = vmax.f32 %v1399_v31, %v1407_v32  ;;  %1376 = vst [vmem:[#allocation3 + $0xc0] sm:$0xff] %v1331_v28  ;;  %v1332_v34 = vmax.f32 %v1225_v29, 0.0  ;;  %v1431_v37 = vld [vmem:[#allocation3 + $0x63] ss:$12 sm:$0xff] }
 0x1d5   : > { %v1443_v42 = vld [vmem:[#allocation3 + $0x64] ss:$12 sm:$0xff]  ;;  %v1455_v48 = vld [vmem:[#allocation3 + $0x65] ss:$12 sm:$0xff]  ;;  %v1467_v51 = vld [vmem:[#allocation3 + $0x66] ss:$12 sm:$0xff] }
 0x1d6   : > { %v1425_v36 = vmax.f32 %v1413_v33, %v1419_v35  ;;  %1377 = vst [vmem:[#allocation3 + $0xc8] sm:$0xff] %v1332_v34  ;;  %v1479_v53 = vld [vmem:[#allocation3 + $0x67] ss:$12 sm:$0xff]  ;;  %v1491_v58 = vld [vmem:[#allocation3 + $0x68] ss:$12 sm:$0xff] }
 0x1d7   : > { %v1229_v38 = vpop.f32.mrb[52].mxu0  ;;  %v1503_v3 = vld [vmem:[#allocation3 + $0x69] ss:$12 sm:$0xff]  ;;  %v1515_v6 = vld [vmem:[#allocation3 + $0x6a] ss:$12 sm:$0xff] }
 0x1d8   : > { %v1437_v39 = vmax.f32 %v1425_v36, %v1431_v37  ;;  %v1230_v40 = vadd.f32 %v4212_v23, %v1229_v38  ;;  %v1231_v41 = vpop.f32.mrb[53].mxu0  ;;  %v1527_v8 = vld [vmem:[#allocation3 + $0x6b] ss:$12 sm:$0xff] }
 0x1d9   : > { %v1232_v43 = vpop.f32.mrb[54].mxu0  ;;  %v3507_v32 = vld [vmem:[%s4706_s3 + $0x90] sm:$0xff]  }
 0x1da   : > { %v1449_v44 = vmax.f32 %v1437_v39, %v1443_v42  ;;  %v1333_v45 = vmax.f32 %v1230_v40, 0.0  ;;  %v1233_v46 = vadd.f32 %v4212_v23, %v1232_v43  ;;  %v1234_v47 = vpop.f32.mrb[55].mxu0  ;;  %v3509_v40 = vld [vmem:[%s4706_s3 + $0xa0] sm:$0xff]  }
 0x1dc   : > { %v1461_v49 = vmax.f32 %v1449_v44, %v1455_v48  ;;  %1378 = vst [vmem:[#allocation3 + $0xd0] sm:$0xff] %v1333_v45  ;;  %v1334_v50 = vmax.f32 %v1233_v46, 0.0  ;;  %v3510_v48 = vld [vmem:[%s4706_s3 + $0xa8] sm:$0xff]  }
 0x1de   : > { %v1473_v52 = vmax.f32 %v1461_v49, %v1467_v51  ;;  %1379 = vst [vmem:[#allocation3 + $0xd8] sm:$0xff] %v1334_v50 }
 0x1df   : > { %v1237_v54 = vpop.f32.mrb[56].mxu0 }
 0x1e0   : > { %v1485_v55 = vmax.f32 %v1473_v52, %v1479_v53  ;;  %v1238_v56 = vadd.f32 %v4212_v23, %v1237_v54  ;;  %v1239_v57 = vpop.f32.mrb[57].mxu0 }
 0x1e1   : > { %v1240_v59 = vpop.f32.mrb[58].mxu0 }
 0x1e2   : > { %v1497_v61 = vmax.f32 %v1485_v55, %v1491_v58  ;;  %v1335_v62 = vmax.f32 %v1238_v56, 0.0  ;;  %v1241_v0 = vadd.f32 %v4212_v23, %v1240_v59  ;;  %v1242_v2 = vpop.f32.mrb[59].mxu0  ;;  %v3511_v55 = vld [vmem:[%s4706_s3 + $0xb0] sm:$0xff]  }
 0x1e4   : > { %v1509_v4 = vmax.f32 %v1497_v61, %v1503_v3  ;;  %1380 = vst [vmem:[#allocation3 + $0xe0] sm:$0xff] %v1335_v62  ;;  %v1336_v5 = vmax.f32 %v1241_v0, 0.0 }
 0x1e6   : > { %v1521_v7 = vmax.f32 %v1509_v4, %v1515_v6  ;;  %1381 = vst [vmem:[#allocation3 + $0xe8] sm:$0xff] %v1336_v5  ;;  %v3512_v6 = vld [vmem:[%s4706_s3 + $0xb8] sm:$0xff]  }
 0x1e7   : > { %v1245_v9 = vpop.f32.mrb[60].mxu0 }
 0x1e8   : > { %v1533_v11 = vmax.f32 %v1521_v7, %v1527_v8  ;;  %v1246_v12 = vadd.f32 %v4212_v23, %v1245_v9  ;;  %v1247_v13 = vpop.f32.mrb[61].mxu0 }
 0x1e9   : > { %v1248_v14 = vpop.f32.mrb[62].mxu0 }
 0x1ea   : > { %1541 = vst [vmem:[#allocation4 + $0x9] sm:$0xff] %v1533_v11  ;;  %v1337_v15 = vmax.f32 %v1246_v12, 0.0  ;;  %v1249_v16 = vadd.f32 %v4212_v23, %v1248_v14  ;;  %v1250_v17 = vpop.f32.mrb[63].mxu0  ;;  %v1581_v18 = vpack.c.bf16 %v1533_v11, %v4241_v60  ;;  %v3506_v60 = vld [vmem:[%s4706_s3 + $0x88] sm:$0xff]  }
 0x1ec   : > { %1382 = vst [vmem:[#allocation3 + $0xf0] sm:$0xff] %v1337_v15  ;;  %v1338_v19 = vmax.f32 %v1249_v16, 0.0  ;;  %1817 = vmatprep.mubr.bf16.mxu1 %v1581_v18 }
 0x1ee   : > { %1383 = vst [vmem:[#allocation3 + $0xf8] sm:$0xff] %v1338_v19 }
 0x1ef   : > { %v1253_v20 = vpop.f32.mrb[64].mxu0 }
 0x1f0   : > { %v1254_v21 = vadd.f32 %v4212_v23, %v1253_v20  ;;  %v1255_v22 = vpop.f32.mrb[65].mxu0 }
 0x1f1   : > { %v1256_v24 = vpop.f32.mrb[66].mxu0  ;;  %v1545_v25 = vld [vmem:[#allocation4 + $0x8] sm:$0xff] }
 0x1f2   : > { %v4268_v26 = vld [vmem:[#allocation4 + $0x2] sm:$0xff]  ;;  %v1339_v27 = vmax.f32 %v1254_v21, 0.0  ;;  %v1257_v28 = vadd.f32 %v4212_v23, %v1256_v24  ;;  %v1258_v29 = vpop.f32.mrb[67].mxu0  ;;  %v1580_v30 = vpack.c.bf16 %v1545_v25, %v4253_v10 }
 0x1f4   : > { %1384 = vst [vmem:[#allocation3 + $0x100] sm:$0xff] %v1339_v27  ;;  %v1340_v31 = vmax.f32 %v1257_v28, 0.0  ;;  %1818 = vmatmul.mubr.bf16.vlgmr.msra.gmra.mrb[0].mxu1 %v1580_v30 }
 0x1f5   : > { %3394 = vmatpush3.bf16.msra.mxu1 %v4247_v63  ;;  %v3508_v63 = vld [vmem:[%s4706_s3 + $0x98] sm:$0xff]  }
 0x1f6   : > { %1385 = vst [vmem:[#allocation3 + $0x108] sm:$0xff] %v1340_v31  ;;  %3395 = vmatprep.subr.bf16.mxu1 %v3506_v60 }
 0x1f7   : > { %v1261_v33 = vpop.f32.mrb[68].mxu0 }
 0x1f8   : > { %v1262_v34 = vadd.f32 %v4212_v23, %v1261_v33  ;;  %v1263_v35 = vpop.f32.mrb[69].mxu0 }
 0x1f9   : > { %v1264_v10 = vpop.f32.mrb[70].mxu0  ;;  %3396 = vmatpush3.bf16.msra.mxu1 %v3506_v60 }
 0x1fa   : > { %v1341_v36 = vmax.f32 %v1262_v34, 0.0  ;;  %v1265_v37 = vadd.f32 %v4212_v23, %v1264_v10  ;;  %v1266_v38 = vpop.f32.mrb[71].mxu0  ;;  %3397 = vmatprep.subr.bf16.mxu1 %v3507_v32 }
 0x1fc   : > { %1386 = vst [vmem:[#allocation3 + $0x110] sm:$0xff] %v1341_v36  ;;  %v1342_v39 = vmax.f32 %v1265_v37, 0.0 }
 0x1fd   : > { %3398 = vmatpush3.bf16.msra.mxu1 %v3507_v32 }
 0x1fe   : > { %1387 = vst [vmem:[#allocation3 + $0x118] sm:$0xff] %v1342_v39  ;;  %3399 = vmatprep.subr.bf16.mxu1 %v3508_v63 }
 0x1ff   : > { %v1269_v41 = vpop.f32.mrb[72].mxu0 }
 0x200   : > { %v1270_v42 = vadd.f32 %v4212_v23, %v1269_v41  ;;  %v1271_v43 = vpop.f32.mrb[73].mxu0 }
 0x201   : > { %v1272_v44 = vpop.f32.mrb[74].mxu0  ;;  %3400 = vmatpush3.bf16.msra.mxu1 %v3508_v63 }
 0x202   : > { %v1343_v45 = vmax.f32 %v1270_v42, 0.0  ;;  %v1273_v46 = vadd.f32 %v4212_v23, %v1272_v44  ;;  %v1274_v47 = vpop.f32.mrb[75].mxu0  ;;  %3401 = vmatprep.subr.bf16.mxu1 %v3509_v40 }
 0x203   : > { %v1401_v49 = vld [vmem:[#allocation3 + $0xc0] ss:$12 sm:$0xff]  ;;  %v1409_v50 = vld [vmem:[#allocation3 + $0xc1] ss:$12 sm:$0xff]  ;;  %v1421_v53 = vld [vmem:[#allocation3 + $0xc2] ss:$12 sm:$0xff] }
 0x204   : > { %v1414_v51 = vmax.f32 %v1401_v49, %v1409_v50  ;;  %1388 = vst [vmem:[#allocation3 + $0x120] sm:$0xff] %v1343_v45  ;;  %v1344_v52 = vmax.f32 %v1273_v46, 0.0  ;;  %v1433_v56 = vld [vmem:[#allocation3 + $0xc3] ss:$12 sm:$0xff] }
 0x205   : > { %3402 = vmatpush3.bf16.msra.mxu1 %v3509_v40  ;;  %v1445_v62 = vld [vmem:[#allocation3 + $0xc4] ss:$12 sm:$0xff]  ;;  %v1457_v7 = vld [vmem:[#allocation3 + $0xc5] ss:$12 sm:$0xff]  ;;  %v1469_v11 = vld [vmem:[#allocation3 + $0xc6] ss:$12 sm:$0xff] }
 0x206   : > { %v1426_v54 = vmax.f32 %v1414_v51, %v1421_v53  ;;  %1389 = vst [vmem:[#allocation3 + $0x128] sm:$0xff] %v1344_v52  ;;  %3403 = vmatprep.subr.bf16.mxu1 %v3510_v48  ;;  %v1481_v13 = vld [vmem:[#allocation3 + $0xc7] ss:$12 sm:$0xff]  ;;  %v1493_v18 = vld [vmem:[#allocation3 + $0xc8] ss:$12 sm:$0xff] }
 0x207   : > { %v1277_v57 = vpop.f32.mrb[76].mxu0  ;;  %v1505_v25 = vld [vmem:[#allocation3 + $0xc9] ss:$12 sm:$0xff]  ;;  %v1517_v29 = vld [vmem:[#allocation3 + $0xca] ss:$12 sm:$0xff] }
 0x208   : > { %v1438_v58 = vmax.f32 %v1426_v54, %v1433_v56  ;;  %v1278_v59 = vadd.f32 %v4212_v23, %v1277_v57  ;;  %v1279_v61 = vpop.f32.mrb[77].mxu0  ;;  %v1529_v60 = vld [vmem:[#allocation3 + $0xcb] ss:$12 sm:$0xff] }
 0x209   : > { %v1280_v0 = vpop.f32.mrb[78].mxu0  ;;  %3404 = vmatpush3.bf16.msra.mxu1 %v3510_v48 }
 0x20a   : > { %v1450_v2 = vmax.f32 %v1438_v58, %v1445_v62  ;;  %v1345_v3 = vmax.f32 %v1278_v59, 0.0  ;;  %v1281_v4 = vadd.f32 %v4212_v23, %v1280_v0  ;;  %v1282_v5 = vpop.f32.mrb[79].mxu0  ;;  %3405 = vmatprep.subr.bf16.mxu1 %v3511_v55 }
 0x20c   : > { %v1462_v8 = vmax.f32 %v1450_v2, %v1457_v7  ;;  %1390 = vst [vmem:[#allocation3 + $0x130] sm:$0xff] %v1345_v3  ;;  %v1346_v9 = vmax.f32 %v1281_v4, 0.0 }
 0x20d   : > { %3406 = vmatpush3.bf16.msra.mxu1 %v3511_v55 }
 0x20e   : > { %v1474_v12 = vmax.f32 %v1462_v8, %v1469_v11  ;;  %1391 = vst [vmem:[#allocation3 + $0x138] sm:$0xff] %v1346_v9  ;;  %3407 = vmatprep.subr.bf16.mxu1 %v3512_v6 }
 0x20f   : > { %v1285_v14 = vpop.f32.mrb[80].mxu0 }
 0x210   : > { %v1486_v15 = vmax.f32 %v1474_v12, %v1481_v13  ;;  %v1286_v16 = vadd.f32 %v4212_v23, %v1285_v14  ;;  %v1287_v17 = vpop.f32.mrb[81].mxu0 }
 0x211   : > { %v1288_v19 = vpop.f32.mrb[82].mxu0  ;;  %3408 = vmatpush3.bf16.msra.mxu1 %v3512_v6 }
 0x212   : > { %v1498_v20 = vmax.f32 %v1486_v15, %v1493_v18  ;;  %v1347_v21 = vmax.f32 %v1286_v16, 0.0  ;;  %v1289_v22 = vadd.f32 %v4212_v23, %v1288_v19  ;;  %v1290_v24 = vpop.f32.mrb[83].mxu0  ;;  %v3513_v19 = vld [vmem:[%s4708_s5 + $0x40] sm:$0xff]  }
 0x213   : > { %3274 = vmatprep.subr.bf16.mxu1 %v3513_v19  ;;  %v3518_v24 = vld [vmem:[%s4708_s5 + $0x10] sm:$0xff]  }
 0x214   : > { %v1510_v27 = vmax.f32 %v1498_v20, %v1505_v25  ;;  %1392 = vst [vmem:[#allocation3 + $0x140] sm:$0xff] %v1347_v21  ;;  %v1348_v28 = vmax.f32 %v1289_v22, 0.0  ;;  %v3514_v20 = vld [vmem:[%s4708_s5] sm:$0xff]   ;;  %v3515_v21 = vld [vmem:[%s4708_s5 + $0x48] sm:$0xff]   ;;  %v3517_v22 = vld [vmem:[%s4708_s5 + $0x50] sm:$0xff]  }
 0x216   : > { %v1522_v30 = vmax.f32 %v1510_v27, %v1517_v29  ;;  %1393 = vst [vmem:[#allocation3 + $0x148] sm:$0xff] %v1348_v28  ;;  %v3519_v27 = vld [vmem:[%s4708_s5 + $0x58] sm:$0xff]  }
 0x217   : > { %v1293_v31 = vpop.f32.mrb[84].mxu0  ;;  %v3520_v29 = vld [vmem:[%s4708_s5 + $0x18] sm:$0xff]  }
 0x218   : > { %v1534_v32 = vmax.f32 %v1522_v30, %v1529_v60  ;;  %v1294_v33 = vadd.f32 %v4212_v23, %v1293_v31  ;;  %v1295_v34 = vpop.f32.mrb[85].mxu0 }
 0x219   : > { %v1296_v35 = vpop.f32.mrb[86].mxu0  ;;  %v3522_v34 = vld [vmem:[%s4708_s5 + $0x20] sm:$0xff]  }
 0x21a   : > { %1542 = vst [vmem:[#allocation4 + $0x11] sm:$0xff] %v1534_v32  ;;  %v1349_v10 = vmax.f32 %v1294_v33, 0.0  ;;  %v1297_v36 = vadd.f32 %v4212_v23, %v1296_v35  ;;  %v1298_v37 = vpop.f32.mrb[87].mxu0  ;;  %v3521_v33 = vld [vmem:[%s4708_s5 + $0x60] sm:$0xff]   ;;  %v3523_v35 = vld [vmem:[%s4708_s5 + $0x68] sm:$0xff]  }
 0x21b   : > { %v3526_v37 = vld [vmem:[%s4708_s5 + $0x30] sm:$0xff]  }
 0x21c   : > { %1394 = vst [vmem:[#allocation3 + $0x150] sm:$0xff] %v1349_v10  ;;  %v1350_v38 = vmax.f32 %v1297_v36, 0.0  ;;  %v3524_v10 = vld [vmem:[%s4708_s5 + $0x28] sm:$0xff]   ;;  %v3525_v36 = vld [vmem:[%s4708_s5 + $0x70] sm:$0xff]  }
 0x21e   : > { %1395 = vst [vmem:[#allocation3 + $0x158] sm:$0xff] %v1350_v38  ;;  %v3527_v38 = vld [vmem:[%s4708_s5 + $0x78] sm:$0xff]  }
 0x21f   : > { %v1301_v63 = vpop.f32.mrb[88].mxu0 }
 0x220   : > { %v1302_v39 = vadd.f32 %v4212_v23, %v1301_v63  ;;  %v1303_v40 = vpop.f32.mrb[89].mxu0  ;;  %v3528_v63 = vld [vmem:[%s4708_s5 + $0x38] sm:$0xff]  }
 0x221   : > { %v1304_v41 = vpop.f32.mrb[90].mxu0  ;;  %v1546_v42 = vld [vmem:[#allocation4 + $0x10] sm:$0xff] }
 0x222   : > { %v1561_v43 = vld [vmem:[#allocation4 + $0xa] sm:$0xff]  ;;  %v1351_v44 = vmax.f32 %v1302_v39, 0.0  ;;  %v1305_v45 = vpop.f32.mrb[91].mxu0 }
 0x223   : > { %v1582_v16 = vpack.c.bf16 %v1561_v43, %v4268_v26  ;;  %v3516_v26 = vld [vmem:[%s4708_s5 + $0x8] sm:$0xff]   ;;  %v3529_v39 = vld [vmem:[%s4708_s5 + $0xc0] sm:$0xff]  }
 0x224   : > { %1396 = vst [vmem:[#allocation3 + $0x160] sm:$0xff] %v1351_v44 }
 0x225   : > { %v1403_v46 = vld [vmem:[#allocation3 + $0x120] ss:$12 sm:$0x3f]  ;;  %v1411_v47 = vld [vmem:[#allocation3 + $0x121] ss:$12 sm:$0x3f] }
 0x226   : > { %v1415_v48 = vmax.f32 %v1403_v46, %v1411_v47  ;;  %v1423_v49 = vld [vmem:[#allocation3 + $0x122] ss:$12 sm:$0x3f]  ;;  %v1435_v51 = vld [vmem:[#allocation3 + $0x123] ss:$12 sm:$0x3f] }
 0x227   : > { %v3120_v46 = vld [vmem:[%s4707_s4] ss:$0 sm:$0xff] }
 0x228   : > { %v1427_v50 = vmax.f32 %v1415_v48, %v1423_v49 }
 0x22a   : > { %v1439_v52 = vmax.f32 %v1427_v50, %v1435_v51 }
 0x22b   : > { %v1447_v53 = vld [vmem:[#allocation3 + $0x124] ss:$12 sm:$0x3f]  ;;  %v1459_v55 = vld [vmem:[#allocation3 + $0x125] ss:$12 sm:$0x3f] }
 0x22c   : > { %v1451_v54 = vmax.f32 %v1439_v52, %v1447_v53  ;;  %v1471_v57 = vld [vmem:[#allocation3 + $0x126] ss:$12 sm:$0x3f]  ;;  %v1483_v58 = vld [vmem:[#allocation3 + $0x127] ss:$12 sm:$0x3f] }
 0x22d   : > { %v1495_v61 = vld [vmem:[#allocation3 + $0x128] ss:$12 sm:$0x3f]  ;;  %v1507_v0 = vld [vmem:[#allocation3 + $0x129] ss:$12 sm:$0x3f] }
 0x22e   : > { %v1463_v56 = vmax.f32 %v1451_v54, %v1459_v55  ;;  %v1519_v3 = vld [vmem:[#allocation3 + $0x12a] ss:$12 sm:$0x3f]  ;;  %v1531_v5 = vld [vmem:[#allocation3 + $0x12b] ss:$12 sm:$0x3f] }
 0x230   : > { %v1475_v23 = vmax.f32 %v1463_v56, %v1471_v57 }
 0x232   : > { %v1487_v59 = vmax.f32 %v1475_v23, %v1483_v58 }
 0x234   : > { %v1499_v62 = vmax.f32 %v1487_v59, %v1495_v61 }
 0x236   : > { %v1511_v2 = vmax.f32 %v1499_v62, %v1507_v0  ;;  %v1900_v0 = vlaneseq }
 0x238   : > { %v1523_v4 = vmax.f32 %v1511_v2, %v1519_v3  ;;  %vm4366_vm3 = vcmp.lt.s32.totalorder %v1900_v0, 128 }
 0x23a   : > { %v1535_v6 = vmax.f32 %v1523_v4, %v1531_v5 }
 0x23c   : > { %1543 = vst [vmem:[#allocation4 + $0x19] sm:$0x3f] %v1535_v6 }
 0x243   : > { %v1555_v7 = vld [vmem:[#allocation4 + $0x19] sm:$0x3f] }
 0x244   : > { %v1547_v8 = vld [vmem:[#allocation4 + $0x18] sm:$0x3f]  ;;  %1559 = vst [vmem:[#allocation5 + $0x50] sm:$0x3f] %v1555_v7 }
 0x245   : > { %v1562_v9 = vld [vmem:[#allocation4 + $0x12] sm:$0xff]  ;;  %1551 = vst [vmem:[#allocation5 + $0x48] sm:$0x3f] %v1547_v8  ;;  %v1563_v11 = vld [vmem:[#allocation4 + $0x1a] sm:$0x3f] }
 0x246   : > { %1567 = vst [vmem:[#allocation5 + $0x58] sm:$0x3f] %v1563_v11 }
 0x24b   : > { %v1578_v12 = vld [vmem:[#allocation5 + $0x50] sm:$0x3f] }
 0x24c   : > { %v1577_v13 = vld [vmem:[#allocation5 + $0x48] sm:$0x3f]  ;;  %v1584_v14 = vpack.c.bf16 %v1578_v12, %v1534_v32 }
 0x24d   : > { %v1583_v15 = vpack.c.bf16 %v1577_v13, %v1546_v42  ;;  %v1579_v17 = vld [vmem:[#allocation5 + $0x58] sm:$0x3f] }
 0x24e   : > { %1825 = vmatprep.mubr.bf16.mxu1 %v1584_v14  ;;  %v1585_v18 = vpack.c.bf16 %v1579_v17, %v1562_v9 }
 0x24f   : > { %1826 = vmatmul.mubr.bf16.gmra.mrb[4].mxu1 %v1583_v15 }
 0x250   : > { %3409 = vmatprep.mubr.bf16.mxu1 %v1582_v16 }
 0x257   : > { %3410 = vmatmul.mubr.bf16.vlgmr.msra.gmra.mrb[8].mxu1 %v1585_v18 }
 0x258   : > { %3275 = vmatpush3.bf16.msra.mxu1 %v3514_v20 }
 0x259   : > { %3276 = vmatprep.subr.bf16.mxu1 %v3515_v21 }
 0x25c   : > { %3277 = vmatpush3.bf16.msra.mxu1 %v3516_v26 }
 0x25d   : > { %3278 = vmatprep.subr.bf16.mxu1 %v3517_v22 }
 0x260   : > { %3279 = vmatpush3.bf16.msra.mxu1 %v3518_v24 }
 0x261   : > { %3280 = vmatprep.subr.bf16.mxu1 %v3519_v27 }
 0x264   : > { %3281 = vmatpush3.bf16.msra.mxu1 %v3520_v29 }
 0x265   : > { %3282 = vmatprep.subr.bf16.mxu1 %v3521_v33 }
 0x268   : > { %3283 = vmatpush3.bf16.msra.mxu1 %v3522_v34 }
 0x269   : > { %3284 = vmatprep.subr.bf16.mxu1 %v3523_v35 }
 0x26c   : > { %3285 = vmatpush3.bf16.msra.mxu1 %v3524_v10 }
 0x26d   : > { %3286 = vmatprep.subr.bf16.mxu1 %v3525_v36 }
 0x270   : > { %3287 = vmatpush3.bf16.msra.mxu1 %v3526_v37 }
 0x271   : > { %3288 = vmatprep.subr.bf16.mxu1 %v3527_v38 }
 0x274   : > { %3289 = vmatpush3.bf16.msra.mxu1 %v3528_v63 }
 0x275   : > { %3296 = vmatprep.subr.bf16.mxu1 %v3529_v39 }
 0x2c7   : > { %v3252_v25 = vpop.f32.mrb[0].mxu1 }
 0x2c8   : > { %v3253_v28 = vpop.f32.mrb[1].mxu1 }
 0x2c9   : > { %v3254_v30 = vadd.f32 %v3253_v28, %v3252_v25  ;;  %v3255_v60 = vpop.f32.mrb[2].mxu1 }
 0x2ca   : > { %v3256_v31 = vpop.f32.mrb[3].mxu1 }
 0x2cb   : > { %v3257_v32 = vadd.f32 %v3256_v31, %v3255_v60  ;;  %v1820_v49 = vadd.f32 %v3254_v30, %v3120_v46 }
 0x2cd   : > { %v1823_v55 = vadd.f32 %v3257_v32, %v3120_v46 }
 0x322   : > { %v3258_v40 = vpop.f32.mrb[4].mxu1 }
 0x323   : > { %v3259_v41 = vpop.f32.mrb[5].mxu1 }
 0x324   : > { %v3260_v42 = vadd.f32 %v3259_v41, %v3258_v40  ;;  %v3261_v43 = vpop.f32.mrb[6].mxu1 }
 0x325   : > { %v3262_v44 = vpop.f32.mrb[7].mxu1 }
 0x326   : > { %v3263_v45 = vadd.f32 %v3262_v44, %v3261_v43  ;;  %v1828_v47 = vadd.f32 %v3260_v42, %v3120_v46 }
 0x328   : > { %v1831_v52 = vadd.f32 %v3263_v45, %v3120_v46 }
 0x32a   : > { %v3411_v48 = vpop.f32.mrb[8].mxu1 }
 0x32b   : > { %v1877_v50 = vadd.f32 %v3411_v48, %v1828_v47  ;;  %v1868_v51 = vpop.f32.mrb[9].mxu1 }
 0x32c   : > { %v1869_v53 = vadd.f32 %v1868_v51, %v1820_v49  ;;  %v3412_v54 = vpop.f32.mrb[10].mxu1 }
 0x32d   : > { %v1885_v56 = vmax.f32 %v1877_v50, 0.0  ;;  %v1880_v57 = vadd.f32 %v3412_v54, %v1831_v52  ;;  %v1871_v23 = vpop.f32.mrb[11].mxu1 }
 0x32e   : > { %v1883_v58 = vmax.f32 %v1869_v53, 0.0  ;;  %v1872_v59 = vadd.f32 %v1871_v23, %v1823_v55 }
 0x32f   : > { %1889 = vst [vmem:[#allocation6 + $0x10] sm:$0xff] %v1885_v56  ;;  %v1886_v61 = vmax.f32 %v1880_v57, 0.0 }
 0x330   : > { %1887 = vst [vmem:[#allocation6] sm:$0xff] %v1883_v58  ;;  %v1884_v62 = vmax.f32 %v1872_v59, 0.0 }
 0x331   : > { %1890 = vst [vmem:[#allocation6 + $0x18] sm:$0x3f] %v1886_v61 }
 0x332   : > { %1888 = vst [vmem:[#allocation6 + $0x8] sm:$0xff] %v1884_v62 }
 0x336   : > { %v1950_v2 = vld [vmem:[#allocation6 + $0x12] sm:$0x7]  ;;  %v1959_v3 = vld [vmem:[#allocation6 + $0x15] sm:$0x7] }
 0x337   : > { %v1951_v4 = vsel %vm1892_vm2, %v1950_v2, -inf  ;;  %v1960_v5 = vsel %vm1892_vm2, %v1959_v3, -inf  ;;  %v1891_v6 = vld [vmem:[#allocation6] sm:$0x7]  ;;  %v1905_v7 = vld [vmem:[#allocation6 + $0x3] sm:$0x7] }
 0x338   : > { %v1952_v8 = vrot.slane %v1951_v4, 4  ;;  %v1961_v9 = vrot.slane %v1960_v5, 4  ;;  %v1893_v11 = vsel %vm1892_vm2, %v1891_v6, -inf  ;;  %v1906_v12 = vsel %vm1892_vm2, %v1905_v7, -inf  ;;  %v1968_v13 = vld [vmem:[#allocation6 + $0x18] sm:$0x7] }
 0x339   : > { %v1894_v14 = vrot.slane %v1893_v11, 4  ;;  %v1907_v15 = vrot.slane %v1906_v12, 4  ;;  %v1969_v16 = vsel %vm1892_vm2, %v1968_v13, -inf  ;;  %v1977_v17 = vld [vmem:[#allocation6 + $0x1b] sm:$0x7] }
 0x33a   : > { %v1953_v19 = vmax.f32 %v1951_v4, %v1952_v8  ;;  %v1962_v20 = vmax.f32 %v1960_v5, %v1961_v9  ;;  %v1970_v21 = vrot.slane %v1969_v16, 4  ;;  %v1978_v26 = vsel %vm1892_vm2, %v1977_v17, -inf  ;;  %v1914_v22 = vld [vmem:[#allocation6 + $0x6] sm:$0x7]  ;;  %v1923_v24 = vld [vmem:[#allocation6 + $0x9] sm:$0x7] }
 0x33b   : > { %v1895_v25 = vmax.f32 %v1893_v11, %v1894_v14  ;;  %v1908_v27 = vmax.f32 %v1906_v12, %v1907_v15  ;;  %v1979_v28 = vrot.slane %v1978_v26, 4  ;;  %v1915_v29 = vsel %vm1892_vm2, %v1914_v22, -inf  ;;  %v1932_v51 = vld [vmem:[#allocation6 + $0xc] sm:$0x7]  ;;  %v1941_v52 = vld [vmem:[#allocation6 + $0xf] sm:$0x7] }
 0x33c   : > { %v1954_v30 = vrot.slane %v1953_v19, 2  ;;  %v1963_v60 = vrot.slane %v1962_v20, 2  ;;  %v1971_v31 = vmax.f32 %v1969_v16, %v1970_v21  ;;  %v1916_v32 = vrot.slane %v1915_v29, 4 }
 0x33d   : > { %v1896_v33 = vrot.slane %v1895_v25, 2  ;;  %v1909_v34 = vrot.slane %v1908_v27, 2  ;;  %v1980_v35 = vmax.f32 %v1978_v26, %v1979_v28  ;;  %v1924_v10 = vsel %vm1892_vm2, %v1923_v24, -inf }
 0x33e   : > { %v1955_v36 = vmax.f32 %v1953_v19, %v1954_v30  ;;  %v1964_v37 = vmax.f32 %v1962_v20, %v1963_v60  ;;  %v1972_v38 = vrot.slane %v1971_v31, 2  ;;  %v1917_v63 = vmax.f32 %v1915_v29, %v1916_v32 }
 0x33f   : > { %v1897_v39 = vmax.f32 %v1895_v25, %v1896_v33  ;;  %v1910_v40 = vmax.f32 %v1908_v27, %v1909_v34  ;;  %v1981_v41 = vrot.slane %v1980_v35, 2  ;;  %v1925_v42 = vrot.slane %v1924_v10, 4 }
 0x340   : > { %v1956_v43 = vrot.slane %v1955_v36, 1  ;;  %v1965_v44 = vrot.slane %v1964_v37, 1  ;;  %v1973_v45 = vmax.f32 %v1971_v31, %v1972_v38  ;;  %v1918_v46 = vrot.slane %v1917_v63, 2 }
 0x341   : > { %v1898_v47 = vrot.slane %v1897_v39, 1  ;;  %v1911_v48 = vrot.slane %v1910_v40, 1  ;;  %v1982_v49 = vmax.f32 %v1980_v35, %v1981_v41  ;;  %v1926_v50 = vmax.f32 %v1924_v10, %v1925_v42  ;;  %v3594_v41 = vld [vmem:[%s4710_s7 + $0x8] sm:$0xff]   ;;  %v3534_v42 = vld [vmem:[%s4708_s5 + $0x90] sm:$0xff]  }
 0x342   : > { %v1957_v53 = vmax.f32 %v1955_v36, %v1956_v43  ;;  %v1966_v54 = vmax.f32 %v1964_v37, %v1965_v44  ;;  %v1974_v55 = vrot.slane %v1973_v45, 1  ;;  %v1919_v56 = vmax.f32 %v1917_v63, %v1918_v46  ;;  %v3530_v36 = vld [vmem:[%s4708_s5 + $0x80] sm:$0xff]   ;;  %v3531_v37 = vld [vmem:[%s4708_s5 + $0xc8] sm:$0xff]   ;;  %v3535_v43 = vld [vmem:[%s4708_s5 + $0xd8] sm:$0xff]  }
 0x343   : > { %v1899_v57 = vmax.f32 %v1897_v39, %v1898_v47  ;;  %v1912_v23 = vmax.f32 %v1910_v40, %v1911_v48  ;;  %v1983_v58 = vrot.slane %v1982_v49, 1  ;;  %v1927_v59 = vrot.slane %v1926_v50, 2  ;;  %v3593_v63 = vld [vmem:[%s4710_s7] sm:$0xff]   ;;  %v3532_v39 = vld [vmem:[%s4708_s5 + $0x88] sm:$0xff]   ;;  %v3533_v40 = vld [vmem:[%s4708_s5 + $0xd0] sm:$0xff]  }
 0x344   : > { %v1920_v61 = vrot.slane %v1919_v56, 1  ;;  %v1933_v62 = vsel %vm1892_vm2, %v1932_v51, -inf  ;;  %v1942_v2 = vsel %vm1892_vm2, %v1941_v52, -inf  ;;  %1958 = vst.msk [vmem:[#allocation7 + $0x6] sm:$0x1] %vm4366_vm3, %v1957_v53  ;;  %v1975_v3 = vmax.f32 %v1973_v45, %v1974_v55  ;;  %3414 = vmatpush3.bf16.msra.mxu0 %v3593_v63  ;;  %v3595_v44 = vld [vmem:[%s4710_s7 + $0x10] sm:$0xff]  }
 0x345   : > { %1967 = vst.msk [vmem:[#allocation7 + $0x7] sm:$0x1] %vm4366_vm3, %v1966_v54  ;;  %v1928_v4 = vmax.f32 %v1926_v50, %v1927_v59  ;;  %v1934_v5 = vrot.slane %v1933_v62, 4  ;;  %v1943_v6 = vrot.slane %v1942_v2, 4  ;;  %1904 = vst.msk [vmem:[#allocation7] sm:$0x1] %vm4366_vm3, %v1899_v57  ;;  %v1984_v7 = vmax.f32 %v1982_v49, %v1983_v58  ;;  %3415 = vmatprep.subr.bf16.mxu0 %v3671_v1 }
 0x346   : > { %1913 = vst.msk [vmem:[#allocation7 + $0x1] sm:$0x1] %vm4366_vm3, %v1912_v23  ;;  %v1921_v8 = vmax.f32 %v1919_v56, %v1920_v61  ;;  %1976 = vst.msk [vmem:[#allocation7 + $0x8] sm:$0x1] %vm4366_vm3, %v1975_v3  ;;  %v4396_v22 = vshrl.u32 %v1900_v0, 7  ;;  %v3536_v45 = vld [vmem:[%s4708_s5 + $0x98] sm:$0xff]  }
 0x347   : > { %v1929_v9 = vrot.slane %v1928_v4, 1  ;;  %v1935_v11 = vmax.f32 %v1933_v62, %v1934_v5  ;;  %v1944_v12 = vmax.f32 %v1942_v2, %v1943_v6  ;;  %1985 = vst.msk [vmem:[#allocation7 + $0x9] sm:$0x1] %vm4366_vm3, %v1984_v7  ;;  %v3537_v46 = vld [vmem:[%s4708_s5 + $0xe0] sm:$0xff]   ;;  %v3539_v48 = vld [vmem:[%s4708_s5 + $0xe8] sm:$0xff]   ;;  %v3541_v50 = vld [vmem:[%s4708_s5 + $0xf0] sm:$0xff]  }
 0x348   : > { %1922 = vst.msk [vmem:[#allocation7 + $0x2] sm:$0x1] %vm4366_vm3, %v1921_v8  ;;  %v1996_v24 = vsub.s32 1, %v4396_v22  ;;  %v1992_v25 = vsub.s32 0, %v4396_v22  ;;  %v2004_v27 = vsub.s32 3, %v4396_v22  ;;  %v2008_v28 = vsub.s32 4, %v4396_v22  ;;  %3416 = vmatpush3.bf16.msra.mxu0 %v3594_v41 }
 0x349   : > { %v1930_v13 = vmax.f32 %v1928_v4, %v1929_v9  ;;  %v1936_v14 = vrot.slane %v1935_v11, 2  ;;  %v1945_v15 = vrot.slane %v1944_v12, 2  ;;  %v2020_v29 = vsub.s32 7, %v4396_v22  ;;  %3417 = vmatprep.subr.bf16.mxu0 %v3671_v1  ;;  %v3538_v47 = vld [vmem:[%s4708_s5 + $0xa0] sm:$0xff]   ;;  %v3540_v49 = vld [vmem:[%s4708_s5 + $0xa8] sm:$0xff]   ;;  %v3542_v51 = vld [vmem:[%s4708_s5 + $0xb0] sm:$0xff]  }
 0x34a   : > { %v2016_v30 = vsub.s32 6, %v4396_v22  ;;  %v3543_v52 = vld [vmem:[%s4708_s5 + $0xf8] sm:$0xff]   ;;  %v2000_v53 = vsub.s32 2, %v4396_v22  ;;  %v2012_v54 = vsub.s32 5, %v4396_v22  ;;  %v3545_v57 = vld [vmem:[%s4708_s5 + $0x140] sm:$0xff]   ;;  %v3547_v61 = vld [vmem:[%s4708_s5 + $0x148] sm:$0xff]  }
 0x34b   : > { %v1937_v16 = vmax.f32 %v1935_v11, %v1936_v14  ;;  %v1946_v17 = vmax.f32 %v1944_v12, %v1945_v15  ;;  %1931 = vst.msk [vmem:[#allocation7 + $0x3] sm:$0x1] %vm4366_vm3, %v1930_v13  ;;  %v3544_v55 = vld [vmem:[%s4708_s5 + $0xb8] sm:$0xff]   ;;  %v3546_v58 = vld [vmem:[%s4708_s5 + $0x100] sm:$0xff]   ;;  %v3548_v2 = vld [vmem:[%s4708_s5 + $0x108] sm:$0xff]  }
 0x34c   : > { %3418 = vmatpush3.bf16.msra.mxu0 %v3595_v44  ;;  %v3549_v3 = vld [vmem:[%s4708_s5 + $0x150] sm:$0xff]   ;;  %v3551_v5 = vld [vmem:[%s4708_s5 + $0x158] sm:$0xff]   ;;  %v3553_v7 = vld [vmem:[%s4708_s5 + $0x160] sm:$0xff]  }
 0x34d   : > { %v1938_v19 = vrot.slane %v1937_v16, 1  ;;  %v1947_v20 = vrot.slane %v1946_v17, 1  ;;  %3419 = vmatprep.subr.bf16.mxu0 %v3671_v1  ;;  %v3550_v4 = vld [vmem:[%s4708_s5 + $0x110] sm:$0xff]   ;;  %v3552_v6 = vld [vmem:[%s4708_s5 + $0x118] sm:$0xff]   ;;  %v3554_v8 = vld [vmem:[%s4708_s5 + $0x120] sm:$0xff]  }
 0x34e   : > { %v3555_v9 = vld [vmem:[%s4708_s5 + $0x168] sm:$0xff]   ;;  %v3557_v12 = vld [vmem:[%s4708_s5 + $0x170] sm:$0xff]   ;;  %v3559_v14 = vld [vmem:[%s4708_s5 + $0x178] sm:$0xff]  }
 0x34f   : > { %v1939_v21 = vmax.f32 %v1937_v16, %v1938_v19  ;;  %v1948_v26 = vmax.f32 %v1946_v17, %v1947_v20  ;;  %v3556_v11 = vld [vmem:[%s4708_s5 + $0x128] sm:$0xff]   ;;  %v3558_v13 = vld [vmem:[%s4708_s5 + $0x130] sm:$0xff]   ;;  %v3560_v15 = vld [vmem:[%s4708_s5 + $0x138] sm:$0xff]  }
 0x350   : > { %v3561_v16 = vld [vmem:[%s4708_s5 + $0x1c0] sm:$0xff]   ;;  %v3563_v20 = vld [vmem:[%s4708_s5 + $0x1c8] sm:$0xff]   ;;  %v3583_v44 = vld [vmem:[%s4708_s5 + $0x258] sm:$0xff]  }
 0x351   : > { %1940 = vst.msk [vmem:[#allocation7 + $0x4] sm:$0x1] %vm4366_vm3, %v1939_v21  ;;  %1949 = vst.msk [vmem:[#allocation7 + $0x5] sm:$0x1] %vm4366_vm3, %v1948_v26  ;;  %v3562_v17 = vld [vmem:[%s4708_s5 + $0x180] sm:$0xff]   ;;  %v3564_v26 = vld [vmem:[%s4708_s5 + $0x188] sm:$0xff]  }
 0x352   : > { %v3579_v41 = vld [vmem:[%s4708_s5 + $0x248] sm:$0xff]   ;;  %v3600_v22 = vld [vmem:[%s4710_s7 + $0x38] sm:$0xff]  }
 0x358   : > { %v1986_v60 = vld [vmem:[#allocation7] sm:$0xff] }
 0x359   : > { %v1997_v18 = vrot.slane %v1986_v60, %v1996_v24  ;;  %v1993_v0 = vrot.slane %v1986_v60, %v1992_v25  ;;  %v2005_v31 = vrot.slane %v1986_v60, %v2004_v27  ;;  %v4408_v32 = vrot.slane %v1986_v60, %v2008_v28  ;;  %v3565_v27 = vld [vmem:[%s4708_s5 + $0x1d0] sm:$0xff]  }
 0x35a   : > { %v4410_v33 = vrot.slane %v1986_v60, %v2020_v29  ;;  %v4412_v34 = vrot.slane %v1986_v60, %v2016_v30  ;;  %v2001_v56 = vrot.slane %v1986_v60, %v2000_v53  ;;  %v2013_v23 = vrot.slane %v1986_v60, %v2012_v54  ;;  %v3566_v28 = vld [vmem:[%s4708_s5 + $0x190] sm:$0xff]   ;;  %v3567_v29 = vld [vmem:[%s4708_s5 + $0x1d8] sm:$0xff]   ;;  %v3569_v60 = vld [vmem:[%s4708_s5 + $0x1e0] sm:$0xff]  }
 0x35b   : > { %v2041_v35 = vpack.c.bf16 %v1997_v18, %v1997_v18  ;;  %v2040_v10 = vpack.c.bf16 %v1993_v0, %v1993_v0  ;;  %v2043_v38 = vpack.c.bf16 %v2005_v31, %v2005_v31  ;;  %v2044_v19 = vpack.c.bf16 %v4408_v32, %v4408_v32  ;;  %v3568_v30 = vld [vmem:[%s4708_s5 + $0x198] sm:$0xff]   ;;  %v3570_v18 = vld [vmem:[%s4708_s5 + $0x1a0] sm:$0xff]   ;;  %v3571_v0 = vld [vmem:[%s4708_s5 + $0x1e8] sm:$0xff]  }
 0x35c   : > { %v2042_v59 = vpack.c.bf16 %v2001_v56, %v2001_v56  ;;  %v2045_v62 = vpack.c.bf16 %v2013_v23, %v2013_v23  ;;  %v2047_v21 = vpack.c.bf16 %v4410_v33, %v4410_v33  ;;  %v3572_v31 = vld [vmem:[%s4708_s5 + $0x1a8] sm:$0xff]   ;;  %v3573_v32 = vld [vmem:[%s4708_s5 + $0x1f0] sm:$0xff]   ;;  %v3597_v53 = vld [vmem:[%s4710_s7 + $0x20] sm:$0xff]  }
 0x35d   : > { %2723 = vmatprep.mubr.bf16.mxu1 %v2041_v35  ;;  %v3574_v33 = vld [vmem:[%s4708_s5 + $0x1b0] sm:$0xff]   ;;  %v3575_v35 = vld [vmem:[%s4708_s5 + $0x1f8] sm:$0xff]  }
 0x35e   : > { %2724 = vmatmul.mubr.bf16.vlgmr.msra.gmra.mrb[12].mxu1 %v2040_v10  ;;  %v3596_v10 = vld [vmem:[%s4710_s7 + $0x18] sm:$0xff]   ;;  %v3599_v23 = vld [vmem:[%s4710_s7 + $0x30] sm:$0xff]  }
 0x35f   : > { %3297 = vmatpush3.bf16.msra.mxu1 %v3530_v36  ;;  %2763 = vmatprep.mubr.bf16.mxu1 %v2043_v38  ;;  %v1987_v36 = vld [vmem:[#allocation7 + $0x8] sm:$0x3]  ;;  %v3592_v54 = vld [vmem:[%s4708_s5 + $0x238] sm:$0xff]  }
 0x360   : > { %3298 = vmatprep.subr.bf16.mxu1 %v3531_v37  ;;  %v3576_v37 = vld [vmem:[%s4708_s5 + $0x1b8] sm:$0xff]   ;;  %3420 = vmatpush3.bf16.msra.mxu0 %v3596_v10  ;;  %v3577_v38 = vld [vmem:[%s4708_s5 + $0x240] sm:$0xff]   ;;  %v2029_v63 = vrot.slane %v1987_v36, %v1996_v24  ;;  %v3580_v24 = vld [vmem:[%s4708_s5 + $0x208] sm:$0xff]  }
 0x361   : > { %3421 = vmatprep.subr.bf16.mxu0 %v3671_v1 }
 0x363   : > { %3299 = vmatpush3.bf16.msra.mxu1 %v3532_v39  ;;  %v3578_v39 = vld [vmem:[%s4708_s5 + $0x200] sm:$0xff]  }
 0x364   : > { %3300 = vmatprep.subr.bf16.mxu1 %v3533_v40  ;;  %v2046_v40 = vpack.c.bf16 %v4412_v34, %v4412_v34  ;;  %v3582_v34 = vld [vmem:[%s4708_s5 + $0x210] sm:$0xff]   ;;  %3422 = vmatpush3.bf16.msra.mxu0 %v3597_v53 }
 0x365   : > { %3423 = vmatprep.subr.bf16.mxu0 %v3671_v1 }
 0x367   : > { %3301 = vmatpush3.bf16.msra.mxu1 %v3534_v42  ;;  %v2049_v42 = vpack.c.bf16 %v2029_v63, %v2029_v63 }
 0x368   : > { %3302 = vmatprep.subr.bf16.mxu1 %v3535_v43  ;;  %v3581_v43 = vld [vmem:[%s4708_s5 + $0x250] sm:$0xff]  }
 0x36b   : > { %3303 = vmatpush3.bf16.msra.mxu1 %v3536_v45  ;;  %v3584_v45 = vld [vmem:[%s4708_s5 + $0x218] sm:$0xff]  }
 0x36c   : > { %3304 = vmatprep.subr.bf16.mxu1 %v3537_v46  ;;  %v3585_v46 = vld [vmem:[%s4708_s5 + $0x260] sm:$0xff]  }
 0x36f   : > { %3305 = vmatpush3.bf16.msra.mxu1 %v3538_v47  ;;  %v3586_v47 = vld [vmem:[%s4708_s5 + $0x220] sm:$0xff]  }
 0x370   : > { %3306 = vmatprep.subr.bf16.mxu1 %v3539_v48  ;;  %v3587_v48 = vld [vmem:[%s4708_s5 + $0x268] sm:$0xff]  }
 0x373   : > { %3307 = vmatpush3.bf16.msra.mxu1 %v3540_v49  ;;  %v3588_v49 = vld [vmem:[%s4708_s5 + $0x228] sm:$0xff]  }
 0x374   : > { %3308 = vmatprep.subr.bf16.mxu1 %v3541_v50  ;;  %v3589_v50 = vld [vmem:[%s4708_s5 + $0x270] sm:$0xff]  }
 0x377   : > { %3309 = vmatpush3.bf16.msra.mxu1 %v3542_v51  ;;  %v3590_v51 = vld [vmem:[%s4708_s5 + $0x230] sm:$0xff]  }
 0x378   : > { %3310 = vmatprep.subr.bf16.mxu1 %v3543_v52  ;;  %v3591_v52 = vld [vmem:[%s4708_s5 + $0x278] sm:$0xff]  }
 0x37b   : > { %3311 = vmatpush3.bf16.msra.mxu1 %v3544_v55  ;;  %v2025_v55 = vrot.slane %v1987_v36, %v1992_v25 }
 0x37c   : > { %3318 = vmatprep.subr.bf16.mxu1 %v3545_v57  ;;  %v3598_v57 = vld [vmem:[%s4710_s7 + $0x28] sm:$0xff]  }
 0x37d   : > { %v2048_v56 = vpack.c.bf16 %v2025_v55, %v2025_v55  ;;  %3424 = vmatpush3.bf16.msra.mxu0 %v3598_v57 }
 0x37e   : > { %2764 = vmatmul.mubr.bf16.vlgmr.msra.gmra.mrb[16].mxu1 %v2042_v59  ;;  %3425 = vmatprep.subr.bf16.mxu0 %v3671_v1 }
 0x37f   : > { %3319 = vmatpush3.bf16.msra.mxu1 %v3546_v58  ;;  %2803 = vmatprep.mubr.bf16.mxu1 %v2045_v62 }
 0x380   : > { %3320 = vmatprep.subr.bf16.mxu1 %v3547_v61 }
 0x381   : > { %3426 = vmatpush3.bf16.msra.mxu0 %v3599_v23 }
 0x382   : > { %3427 = vmatprep.subr.bf16.mxu0 %v3671_v1 }
 0x383   : > { %3321 = vmatpush3.bf16.msra.mxu1 %v3548_v2  ;;  %v2210_v2 = vld [vmem:[%s4709_s6] sm:$0x1] }
 0x384   : > { %3322 = vmatprep.subr.bf16.mxu1 %v3549_v3 }
 0x385   : > { %3428 = vmatpush3.bf16.msra.mxu0 %v3600_v22 }
 0x387   : > { %3323 = vmatpush3.bf16.msra.mxu1 %v3550_v4 }
 0x388   : > { %3324 = vmatprep.subr.bf16.mxu1 %v3551_v5 }
 0x38b   : > { %3325 = vmatpush3.bf16.msra.mxu1 %v3552_v6 }
 0x38c   : > { %3326 = vmatprep.subr.bf16.mxu1 %v3553_v7 }
 0x38f   : > { %3327 = vmatpush3.bf16.msra.mxu1 %v3554_v8 }
 0x390   : > { %3328 = vmatprep.subr.bf16.mxu1 %v3555_v9 }
 0x393   : > { %3329 = vmatpush3.bf16.msra.mxu1 %v3556_v11 }
 0x394   : > { %3330 = vmatprep.subr.bf16.mxu1 %v3557_v12 }
 0x397   : > { %3331 = vmatpush3.bf16.msra.mxu1 %v3558_v13 }
 0x398   : > { %3332 = vmatprep.subr.bf16.mxu1 %v3559_v14 }
 0x39b   : > { %3333 = vmatpush3.bf16.msra.mxu1 %v3560_v15 }
 0x39c   : > { %3340 = vmatprep.subr.bf16.mxu1 %v3561_v16 }
 0x39e   : > { %2804 = vmatmul.mubr.bf16.vlgmr.msra.gmra.mrb[20].mxu1 %v2044_v19 }
 0x39f   : > { %3341 = vmatpush3.bf16.msra.mxu1 %v3562_v17  ;;  %2843 = vmatprep.mubr.bf16.mxu1 %v2047_v21 }
 0x3a0   : > { %3342 = vmatprep.subr.bf16.mxu1 %v3563_v20 }
 0x3a3   : > { %3343 = vmatpush3.bf16.msra.mxu1 %v3564_v26 }
 0x3a4   : > { %3344 = vmatprep.subr.bf16.mxu1 %v3565_v27 }
 0x3a7   : > { %3345 = vmatpush3.bf16.msra.mxu1 %v3566_v28 }
 0x3a8   : > { %3346 = vmatprep.subr.bf16.mxu1 %v3567_v29 }
 0x3ab   : > { %3347 = vmatpush3.bf16.msra.mxu1 %v3568_v30 }
 0x3ac   : > { %3348 = vmatprep.subr.bf16.mxu1 %v3569_v60 }
 0x3af   : > { %3349 = vmatpush3.bf16.msra.mxu1 %v3570_v18 }
 0x3b0   : > { %3350 = vmatprep.subr.bf16.mxu1 %v3571_v0 }
 0x3b3   : > { %3351 = vmatpush3.bf16.msra.mxu1 %v3572_v31 }
 0x3b4   : > { %3352 = vmatprep.subr.bf16.mxu1 %v3573_v32  ;;  %v2909_v32 = vld [vmem:[%s4711_s8] sm:$0x1] }
 0x3b7   : > { %3353 = vmatpush3.bf16.msra.mxu1 %v3574_v33 }
 0x3b8   : > { %3354 = vmatprep.subr.bf16.mxu1 %v3575_v35 }
 0x3bb   : > { %3355 = vmatpush3.bf16.msra.mxu1 %v3576_v37 }
 0x3bc   : > { %3362 = vmatprep.subr.bf16.mxu1 %v3577_v38 }
 0x3be   : > { %2844 = vmatmul.mubr.bf16.vlgmr.msra.gmra.mrb[24].mxu1 %v2046_v40 }
 0x3bf   : > { %3363 = vmatpush3.bf16.msra.mxu1 %v3578_v39  ;;  %2883 = vmatprep.mubr.bf16.mxu1 %v2049_v42 }
 0x3c0   : > { %3364 = vmatprep.subr.bf16.mxu1 %v3579_v41 }
 0x3c3   : > { %3365 = vmatpush3.bf16.msra.mxu1 %v3580_v24 }
 0x3c4   : > { %3366 = vmatprep.subr.bf16.mxu1 %v3581_v43 }
 0x3c7   : > { %3367 = vmatpush3.bf16.msra.mxu1 %v3582_v34 }
 0x3c8   : > { %3368 = vmatprep.subr.bf16.mxu1 %v3583_v44 }
 0x3cb   : > { %3369 = vmatpush3.bf16.msra.mxu1 %v3584_v45 }
 0x3cc   : > { %3370 = vmatprep.subr.bf16.mxu1 %v3585_v46 }
 0x3cf   : > { %3371 = vmatpush3.bf16.msra.mxu1 %v3586_v47 }
 0x3d0   : > { %3372 = vmatprep.subr.bf16.mxu1 %v3587_v48 }
 0x3d3   : > { %3373 = vmatpush3.bf16.msra.mxu1 %v3588_v49 }
 0x3d4   : > { %3374 = vmatprep.subr.bf16.mxu1 %v3589_v50 }
 0x3d7   : > { %3375 = vmatpush3.bf16.msra.mxu1 %v3590_v51 }
 0x3d8   : > { %3376 = vmatprep.subr.bf16.mxu1 %v3591_v52 }
 0x3db   : > { %3377 = vmatpush3.bf16.msra.mxu1 %v3592_v54 }
 0x3de   : > { %2884 = vmatmul.mubr.bf16.vlgmr.msra.gmra.mrb[28].mxu1 %v2048_v56 }
 0x431   : > { %v3290_v25 = vpop.f32.mrb[12].mxu1 }
 0x432   : > { %v3291_v58 = vpop.f32.mrb[13].mxu1 }
 0x433   : > { %v3292_v59 = vadd.f32 %v3291_v58, %v3290_v25  ;;  %v3293_v61 = vpop.f32.mrb[14].mxu1 }
 0x434   : > { %v3294_v62 = vpop.f32.mrb[15].mxu1 }
 0x435   : > { %v2726_v5 = vadd.f32 %v3292_v59, %v2210_v2 }
 0x451   : > { %v3312_v3 = vpop.f32.mrb[16].mxu1 }
 0x452   : > { %v3313_v4 = vpop.f32.mrb[17].mxu1 }
 0x453   : > { %v3314_v6 = vadd.f32 %v3313_v4, %v3312_v3  ;;  %v3315_v7 = vpop.f32.mrb[18].mxu1 }
 0x454   : > { %v3316_v8 = vpop.f32.mrb[19].mxu1 }
 0x455   : > { %v2766_v9 = vadd.f32 %v3314_v6, %v2726_v5 }
 0x471   : > { %v3334_v11 = vpop.f32.mrb[20].mxu1 }
 0x472   : > { %v3335_v12 = vpop.f32.mrb[21].mxu1 }
 0x473   : > { %v3336_v13 = vadd.f32 %v3335_v12, %v3334_v11  ;;  %v3337_v14 = vpop.f32.mrb[22].mxu1 }
 0x474   : > { %v3338_v15 = vpop.f32.mrb[23].mxu1 }
 0x475   : > { %v2806_v16 = vadd.f32 %v3336_v13, %v2766_v9 }
 0x491   : > { %v3356_v17 = vpop.f32.mrb[24].mxu1 }
 0x492   : > { %v3357_v19 = vpop.f32.mrb[25].mxu1 }
 0x493   : > { %v3358_v1 = vadd.f32 %v3357_v19, %v3356_v17  ;;  %v3359_v20 = vpop.f32.mrb[26].mxu1 }
 0x494   : > { %v3360_v21 = vpop.f32.mrb[27].mxu1 }
 0x495   : > { %v2846_v26 = vadd.f32 %v3358_v1, %v2806_v16 }
 0x4b1   : > { %v3378_v27 = vpop.f32.mrb[28].mxu1 }
 0x4b2   : > { %v3379_v28 = vpop.f32.mrb[29].mxu1 }
 0x4b3   : > { %v3380_v29 = vadd.f32 %v3379_v28, %v3378_v27  ;;  %v3381_v30 = vpop.f32.mrb[30].mxu1 }
 0x4b4   : > { %v3382_v60 = vpop.f32.mrb[31].mxu1 }
 0x4b5   : > { %v2886_v18 = vadd.f32 %v3380_v29, %v2846_v26 }
 0x4b7   : > { %v2891_v0 = vmax.f32 %v2886_v18, 0.0 }
 0x4b9   : > { %v2892_v31 = vpack.c.bf16 %v2891_v0, %v2891_v0 }
 0x4bb   : > { %3430 = vmatmul.mubr.bf16.vlgmr.msra.gmra.mrb[92].mxu0 %v2892_v31 }
 0x58e   : > { %v2992_v33 = vpop.f32.mrb[92].mxu0 }
 0x58f   : > { %v2993_v35 = vadd.f32 %v2992_v33, %v2909_v32  ;;  %v3431_v10 = vpop.f32.mrb[93].mxu0 }
 0x590   : > { %v2995_v36 = vpop.f32.mrb[94].mxu0 }
 0x591   : > { %v3432_v37 = vpop.f32.mrb[95].mxu0  ;;  %v2999_v38 = vsel %vm2998_vm5, %v2993_v35, -inf }
 0x592   : > { %3000 = vmax.xlane.f32.xlu1 %v2999_v38 }
 0x61f   : > { %v3001_v63 = vpop.xlane.xlu1 %3000 }
 0x620   : > { %v3002_v39 = vsub.f32 %v2993_v35, %v3001_v63 }
 0x622   : > { %v3003_v40 = vmul.f32 1.442695, %v3002_v39 }
 0x624   : > { %3601 = vpow2.f32 %v3003_v40 }
 0x62e   : > { %v3602_v41 = vpop.eup %3601 }
 0x62f   : > { %v3005_v42 = vsel %vm2998_vm5, %v3602_v41, 0.0 }
 0x630   : > { %3006 = vadd.xlane.f32.xlu0 %v3005_v42 }
 0x6bd   : > { %v3007_v24 = vpop.xlane.xlu0 %3006 }
 0x6be   : > { %3603 = vrcp.f32 %v3007_v24 }
 0x6c8   : > { %v3604_v43 = vpop.eup %3603 }
 0x6c9   : > { %v3009_v34 = vmul.f32 %v3604_v43, %v3602_v41 }
 0x6cb   : > { %3010 = vst.msk [vmem:[%s324_s23] sm:$0x1] %vm2998_vm5, %v3009_v34 }
 0x6cc   : > { %3618 = shalt.err (!%p3615_p3)
}
 0x6cd   : > { %s3619_s16 = scalar_lea.hbm %s4660_s27, 16  ;;  %s3623_s23 = scalar_lea.hbm %s4712_s9, 32 }
 0x6ce   : > { %p3620_p4 = scmp.ne.s32.totalorder %s4660_s27, %s3619_s16  ;;  %p3624_p9 = scmp.lt.u32.totalorder %s4660_s27, %s4712_s9 }
 0x6cf   : > { %p3625_p10 = scmp.lt.u32.totalorder %s3623_s23, %s3619_s16  ;;  %p3627_p12 = scmp.lt.u32.totalorder %s3619_s16, %s4660_s27 }
 0x6d0   : > { %p3621_p7 = pnand %p3620_p4, %p3762_p5 }
 0x6d1   : > { %p3626_p11 = por %p3625_p10, %p3624_p9 }
 0x6d2   : > { %p3622_p8 = pneg %p3621_p7 }
 0x6d3   : > { %p3628_p13 = por %p3627_p12, %p3626_p11 }
 0x6d5   : > { %p3629_p0 = pnand %p3628_p13, %p3622_p8 }
 0x6d7   : > { %3632 = shalt.err (!%p3629_p0)
}
 0x6d8   : > { %3434 = dma.vmem_to_hbm [thread:$0]  (%p3762_p5), %s4662_s24, 16, %s4660_s27, %s3012_s28  }
 0x6d9 PF: > { %p3440_p1 = scmp.ge.s32.totalorder %s3667_s12, 2  ;;  %s3036_s29 = sand.u32 1, %s3655_s30  }
 0x6da   : > { %s3037_s13 = scalar_lea.sflag [#allocation9], %s3036_s29 }
 0x6db   : > { %p3437_p2 = pnand %p3440_p1, %p3766_p6 }
 0x6dd   : > { %3650 = dma.done.wait (!%p3437_p2), %s3037_s13, 16  }
 0x6de   : > { %3652 = vsyncadd (!%p3437_p2), %s3037_s13, 4294967280  ;;  %p19_p3 = scmp.ge.s32.totalorder %s3749_s15, 4   ;;  %s4717_s30 = smov %s3659_s10 }
 0x6df   : > { %s4718_s10 = smov %s3663_s11  ;;  %s4719_s11 = smov %s3760_s18 }
 0x6e0   : > { %s4720_s12 = smov %s3749_s15  ;;  %21 = sbr.rel (!%p19_p3) target bundleno = 3 (0x3), region = 138 }
 0x6e7   :  { %3041 = vsyncpa [#allocation9], 1 }
 0x6e8   :  { %3043 = vsyncpa [#allocation9 + $0x1], 1 }

</bundles_post_ra>
